<compile_context>
chip_gen: v7x
topology: tpu7x:2x2x1
jax: 0.10.0
libtpu: 0.0.40
codegen_flags: <defaults>
</compile_context>

<pallas_src>
import functools

import jax
import jax.numpy as jnp
from jax import lax
from jax.experimental import pallas as pl
from jax.experimental.pallas import tpu as pltpu


# --------------------------------------------------------------------------- #
# Fused kernel: layer0 recurrence -> layer1 recurrence -> FC epilogue
# --------------------------------------------------------------------------- #
def _fused_stock_lstm_kernel(
    x_ref,        # (T*B, F)  time-major input, (t, b) rows flattened
    wih0_ref,     # (F, 4H)
    whh0_ref,     # (H, 4H)
    b0_ref,       # (1, 4H)   = b_ih0 + b_hh0
    wih1_ref,     # (H, 4H)
    whh1_ref,     # (H, 4H)
    b1_ref,       # (1, 4H)   = b_ih1 + b_hh1
    wfc_ref,      # (H, O)
    bfc_ref,      # (1, O)
    out_ref,      # (B, O)
    hseq_scr,     # VMEM (T*B, H): layer-0 hidden states, kept on-chip
    *, T, B,
):
    H = whh0_ref.shape[0]

    # Lane mask for the tanh ("g") gate inside the packed (i, f, g, o) layout.
    # Hoisted: computed once, reused every step of both layers.
    lane = lax.broadcasted_iota(jnp.int32, (B, 4 * H), 1)
    g_mask = (lane >= 2 * H) & (lane < 3 * H)

    def cell(gates, c_prev):
        # Full-width activations: one sigmoid pass + one tanh pass + select,
        # instead of four 32-lane sliced transcendental calls.
        act = jnp.where(g_mask, jnp.tanh(gates), jax.nn.sigmoid(gates))
        i_g = act[:, 0 * H:1 * H]
        f_g = act[:, 1 * H:2 * H]
        g_g = act[:, 2 * H:3 * H]
        o_g = act[:, 3 * H:4 * H]
        c_new = f_g * c_prev + i_g * g_g
        h_new = o_g * jnp.tanh(c_new)
        return h_new, c_new

    zeros = jnp.zeros((B, H), jnp.float32)

    # ---------------- Layer 0 ----------------
    # Hoisted input projection for all T steps (bias folded in here, once).
    xp0 = jnp.dot(x_ref[...], wih0_ref[...],
                  preferred_element_type=jnp.float32) + b0_ref[...]
    whh0 = whh0_ref[...]
    h, c = zeros, zeros
    for t in range(T):                                   # static unroll (T small)
        gates = xp0[t * B:(t + 1) * B, :] + jnp.dot(
            h, whh0, preferred_element_type=jnp.float32)
        h, c = cell(gates, c)
        hseq_scr[pl.ds(t * B, B), :] = h                 # stays in VMEM

    # ---------------- Layer 1 ----------------
    xp1 = jnp.dot(hseq_scr[...], wih1_ref[...],
                  preferred_element_type=jnp.float32) + b1_ref[...]
    whh1 = whh1_ref[...]
    h, c = zeros, zeros
    for t in range(T):
        gates = xp1[t * B:(t + 1) * B, :] + jnp.dot(
            h, whh1, preferred_element_type=jnp.float32)
        h, c = cell(gates, c)

    # ---------------- FC epilogue (only the last hidden state is needed) ----
    out_ref[...] = (
        jnp.dot(h, wfc_ref[...], preferred_element_type=jnp.float32)
        + bfc_ref[...]
    )


# --------------------------------------------------------------------------- #
# Parameter prep (done ONCE, outside the per-call forward)
# --------------------------------------------------------------------------- #
def prepare_params(params):
    """Pre-transpose PyTorch-layout weights and pre-sum biases."""
    (w_ih0, w_hh0, b_ih0, b_hh0), (w_ih1, w_hh1, b_ih1, b_hh1) = params["layers"]
    return {
        "wih0_t": jnp.transpose(w_ih0),               # (F, 4H)
        "whh0_t": jnp.transpose(w_hh0),               # (H, 4H)
        "b0": (b_ih0 + b_hh0).reshape(1, -1),         # (1, 4H)
        "wih1_t": jnp.transpose(w_ih1),               # (H, 4H)
        "whh1_t": jnp.transpose(w_hh1),               # (H, 4H)
        "b1": (b_ih1 + b_hh1).reshape(1, -1),         # (1, 4H)
        "wfc_t": jnp.transpose(params["w_fc"]),       # (H, O)
        "bfc": params["b_fc"].reshape(1, -1),         # (1, O)
    }


# --------------------------------------------------------------------------- #
# Forward: one fused pallas_call
# --------------------------------------------------------------------------- #
@jax.jit
def stock_lstm_forward(x_btf, fp):
    B, T, F = x_btf.shape
    H = fp["whh0_t"].shape[0]
    O = fp["wfc_t"].shape[1]

    # time-major, (t, b) rows flattened so the kernel only does 2-D matmuls
    x2d = jnp.transpose(x_btf, (1, 0, 2)).astype(jnp.float32).reshape(T * B, F)

    kernel = functools.partial(_fused_stock_lstm_kernel, T=T, B=B)
    vmem_spec = pl.BlockSpec(memory_space=pltpu.MemorySpace.VMEM)

    return pl.pallas_call(
        kernel,
        out_shape=jax.ShapeDtypeStruct((B, O), jnp.float32),
        in_specs=[vmem_spec] * 9,
        out_specs=vmem_spec,
        scratch_shapes=[pltpu.VMEM((T * B, H), jnp.float32)],
    )(x2d,
      fp["wih0_t"], fp["whh0_t"], fp["b0"],
      fp["wih1_t"], fp["whh1_t"], fp["b1"],
      fp["wfc_t"], fp["bfc"])


# --------------------------------------------------------------------------- #
# Synthetic parameters (PyTorch-style shapes & uniform(-k, k) init)
# --------------------------------------------------------------------------- #
def init_params(key, input_size, hidden_size, num_layers, output_size):
    params = {"layers": []}
    k = 1.0 / jnp.sqrt(hidden_size)
    for layer in range(num_layers):
        f_in = input_size if layer == 0 else hidden_size
        key, k1, k2, k3, k4 = jax.random.split(key, 5)
        w_ih = jax.random.uniform(k1, (4 * hidden_size, f_in), jnp.float32, -k, k)
        w_hh = jax.random.uniform(k2, (4 * hidden_size, hidden_size), jnp.float32, -k, k)
        b_ih = jax.random.uniform(k3, (4 * hidden_size,), jnp.float32, -k, k)
        b_hh = jax.random.uniform(k4, (4 * hidden_size,), jnp.float32, -k, k)
        params["layers"].append((w_ih, w_hh, b_ih, b_hh))
    key, k5, k6 = jax.random.split(key, 3)
    kf = 1.0 / jnp.sqrt(hidden_size)
    params["w_fc"] = jax.random.uniform(k5, (output_size, hidden_size), jnp.float32, -kf, kf)
    params["b_fc"] = jax.random.uniform(k6, (output_size,), jnp.float32, -kf, kf)
    return params


# --------------------------------------------------------------------------- #
# Pure-JAX reference (lax.scan) for correctness check
# --------------------------------------------------------------------------- #
def reference_forward(x_btf, params):
    x = jnp.transpose(x_btf, (1, 0, 2)).astype(jnp.float32)  # (T, B, F)
    B = x.shape[1]
    for (w_ih, w_hh, b_ih, b_hh) in params["layers"]:
        H = w_hh.shape[1]

        def step(carry, x_t):
            h, c = carry
            gates = x_t @ w_ih.T + h @ w_hh.T + b_ih + b_hh
            i = jax.nn.sigmoid(gates[:, 0 * H:1 * H])
            f = jax.nn.sigmoid(gates[:, 1 * H:2 * H])
            g = jnp.tanh(gates[:, 2 * H:3 * H])
            o = jax.nn.sigmoid(gates[:, 3 * H:4 * H])
            c = f * c + i * g
            h = o * jnp.tanh(c)
            return (h, c), h

        init = (jnp.zeros((B, H), jnp.float32), jnp.zeros((B, H), jnp.float32))
        _, x = jax.lax.scan(step, init, x)
    return x[-1] @ params["w_fc"].T + params["b_fc"]


if __name__ == "__main__":
    # Small shapes consistent with the module: batch=2, seq=8, input_size=8,
    # hidden=32, num_layers=2, output=5.
    B, T, F = 2, 8, 8
    HIDDEN, LAYERS, OUT = 32, 2, 5

    key = jax.random.PRNGKey(0)
    key, kx = jax.random.split(key)
    x = jax.random.normal(kx, (B, T, F), dtype=jnp.float32)

    params = init_params(key, F, HIDDEN, LAYERS, OUT)
    fused_params = prepare_params(params)

    out = stock_lstm_forward(x, fused_params)
    out = jax.block_until_ready(out)

    ref = reference_forward(x, params)
    assert out.shape == (B, OUT)
    assert jnp.allclose(out, ref, atol=1e-4, rtol=1e-4), "mismatch vs reference"

    print("KERNEL_OK")
</pallas_src>

<mosaic_0001>
module attributes {stable_mosaic.version = 11 : i64} {
  func.func @_fused_stock_lstm_kernel(%arg0: memref<16x8xf32, #tpu.memory_space<vmem>>, %arg1: memref<8x128xf32, #tpu.memory_space<vmem>>, %arg2: memref<32x128xf32, #tpu.memory_space<vmem>>, %arg3: memref<1x128xf32, #tpu.memory_space<vmem>>, %arg4: memref<32x128xf32, #tpu.memory_space<vmem>>, %arg5: memref<32x128xf32, #tpu.memory_space<vmem>>, %arg6: memref<1x128xf32, #tpu.memory_space<vmem>>, %arg7: memref<32x5xf32, #tpu.memory_space<vmem>>, %arg8: memref<1x5xf32, #tpu.memory_space<vmem>>, %arg9: memref<2x5xf32, #tpu.memory_space<vmem>>, %arg10: memref<16x32xf32, #tpu.memory_space<vmem>>) attributes {dimension_semantics = [], scalar_prefetch = 0 : i64, scratch_operands = 1 : i64, tpu.core_type = #tpu.core_type<tc>} {
    %0 = tpu.iota {dimensions = array<i32: 1>} : vector<2x128xi32>
    %c64_i32 = arith.constant 64 : i32
    %1 = vector.broadcast %c64_i32 : i32 to vector<2x128xi32>
    %2 = arith.cmpi sge, %0, %1 : vector<2x128xi32>
    %c96_i32 = arith.constant 96 : i32
    %3 = vector.broadcast %c96_i32 : i32 to vector<2x128xi32>
    %4 = arith.cmpi slt, %0, %3 : vector<2x128xi32>
    %5 = arith.andi %2, %4 : vector<2x128xi1>
    %cst = arith.constant 0.000000e+00 : f32
    %6 = vector.broadcast %cst : f32 to vector<2x32xf32>
    %c0 = arith.constant 0 : index
    %c0_0 = arith.constant 0 : index
    %7 = vector.load %arg0[%c0, %c0_0] : memref<16x8xf32, #tpu.memory_space<vmem>>, vector<16x8xf32>
    %c0_1 = arith.constant 0 : index
    %c0_2 = arith.constant 0 : index
    %8 = vector.load %arg1[%c0_1, %c0_2] : memref<8x128xf32, #tpu.memory_space<vmem>>, vector<8x128xf32>
    %cst_3 = arith.constant dense<0.000000e+00> : vector<16x128xf32>
    %9 = tpu.matmul %7, %8, %cst_3 {dimension_numbers = #tpu.dot_dimension_numbers<[1], [0], [0], [1], [0, 0, 1, 1], [], []>} : vector<16x8xf32>, vector<8x128xf32>, vector<16x128xf32> -> vector<16x128xf32>
    %c0_4 = arith.constant 0 : index
    %c0_5 = arith.constant 0 : index
    %10 = vector.load %arg3[%c0_4, %c0_5] : memref<1x128xf32, #tpu.memory_space<vmem>>, vector<1x128xf32>
    %11 = vector.broadcast %10 : vector<1x128xf32> to vector<16x128xf32>
    %12 = arith.addf %9, %11 : vector<16x128xf32>
    %c0_6 = arith.constant 0 : index
    %c0_7 = arith.constant 0 : index
    %13 = vector.load %arg2[%c0_6, %c0_7] : memref<32x128xf32, #tpu.memory_space<vmem>>, vector<32x128xf32>
    %14 = vector.extract_strided_slice %12 {offsets = [0, 0], sizes = [2, 128], strides = [1, 1]} : vector<16x128xf32> to vector<2x128xf32>
    %cst_8 = arith.constant dense<0.000000e+00> : vector<2x128xf32>
    %15 = tpu.matmul %6, %13, %cst_8 {dimension_numbers = #tpu.dot_dimension_numbers<[1], [0], [0], [1], [0, 0, 1, 1], [], []>} : vector<2x32xf32>, vector<32x128xf32>, vector<2x128xf32> -> vector<2x128xf32>
    %16 = arith.addf %14, %15 : vector<2x128xf32>
    %17 = math.tanh %16 : vector<2x128xf32>
    %18 = arith.negf %16 : vector<2x128xf32>
    %19 = math.exp %18 : vector<2x128xf32>
    %cst_9 = arith.constant 1.000000e+00 : f32
    %20 = vector.broadcast %cst_9 : f32 to vector<2x128xf32>
    %21 = arith.addf %20, %19 : vector<2x128xf32>
    %22 = arith.divf %20, %21 : vector<2x128xf32>
    %23 = arith.select %5, %17, %22 : vector<2x128xi1>, vector<2x128xf32>
    %24 = vector.extract_strided_slice %23 {offsets = [0, 0], sizes = [2, 32], strides = [1, 1]} : vector<2x128xf32> to vector<2x32xf32>
    %25 = vector.extract_strided_slice %23 {offsets = [0, 32], sizes = [2, 32], strides = [1, 1]} : vector<2x128xf32> to vector<2x32xf32>
    %26 = vector.extract_strided_slice %23 {offsets = [0, 64], sizes = [2, 32], strides = [1, 1]} : vector<2x128xf32> to vector<2x32xf32>
    %27 = vector.extract_strided_slice %23 {offsets = [0, 96], sizes = [2, 32], strides = [1, 1]} : vector<2x128xf32> to vector<2x32xf32>
    %28 = arith.mulf %25, %6 : vector<2x32xf32>
    %29 = arith.mulf %24, %26 : vector<2x32xf32>
    %30 = arith.addf %28, %29 : vector<2x32xf32>
    %31 = math.tanh %30 : vector<2x32xf32>
    %32 = arith.mulf %27, %31 : vector<2x32xf32>
    %c0_10 = arith.constant 0 : index
    %c0_11 = arith.constant 0 : index
    %33 = vector.load %arg10[%c0_10, %c0_11] : memref<16x32xf32, #tpu.memory_space<vmem>>, vector<2x32xf32>
    tpu.vector_store %arg10[%c0_10, %c0_11], %32 {strides = array<i32>} : memref<16x32xf32, #tpu.memory_space<vmem>>, vector<2x32xf32>,
    %34 = vector.extract_strided_slice %12 {offsets = [2, 0], sizes = [2, 128], strides = [1, 1]} : vector<16x128xf32> to vector<2x128xf32>
    %cst_12 = arith.constant dense<0.000000e+00> : vector<2x128xf32>
    %35 = tpu.matmul %32, %13, %cst_12 {dimension_numbers = #tpu.dot_dimension_numbers<[1], [0], [0], [1], [0, 0, 1, 1], [], []>} : vector<2x32xf32>, vector<32x128xf32>, vector<2x128xf32> -> vector<2x128xf32>
    %36 = arith.addf %34, %35 : vector<2x128xf32>
    %37 = math.tanh %36 : vector<2x128xf32>
    %38 = arith.negf %36 : vector<2x128xf32>
    %39 = math.exp %38 : vector<2x128xf32>
    %cst_13 = arith.constant 1.000000e+00 : f32
    %40 = vector.broadcast %cst_13 : f32 to vector<2x128xf32>
    %41 = arith.addf %40, %39 : vector<2x128xf32>
    %42 = arith.divf %40, %41 : vector<2x128xf32>
    %43 = arith.select %5, %37, %42 : vector<2x128xi1>, vector<2x128xf32>
    %44 = vector.extract_strided_slice %43 {offsets = [0, 0], sizes = [2, 32], strides = [1, 1]} : vector<2x128xf32> to vector<2x32xf32>
    %45 = vector.extract_strided_slice %43 {offsets = [0, 32], sizes = [2, 32], strides = [1, 1]} : vector<2x128xf32> to vector<2x32xf32>
    %46 = vector.extract_strided_slice %43 {offsets = [0, 64], sizes = [2, 32], strides = [1, 1]} : vector<2x128xf32> to vector<2x32xf32>
    %47 = vector.extract_strided_slice %43 {offsets = [0, 96], sizes = [2, 32], strides = [1, 1]} : vector<2x128xf32> to vector<2x32xf32>
    %48 = arith.mulf %45, %30 : vector<2x32xf32>
    %49 = arith.mulf %44, %46 : vector<2x32xf32>
    %50 = arith.addf %48, %49 : vector<2x32xf32>
    %51 = math.tanh %50 : vector<2x32xf32>
    %52 = arith.mulf %47, %51 : vector<2x32xf32>
    %c2 = arith.constant 2 : index
    %c0_14 = arith.constant 0 : index
    %53 = vector.load %arg10[%c2, %c0_14] : memref<16x32xf32, #tpu.memory_space<vmem>>, vector<2x32xf32>
    tpu.vector_store %arg10[%c2, %c0_14], %52 {strides = array<i32>} : memref<16x32xf32, #tpu.memory_space<vmem>>, vector<2x32xf32>,
    %54 = vector.extract_strided_slice %12 {offsets = [4, 0], sizes = [2, 128], strides = [1, 1]} : vector<16x128xf32> to vector<2x128xf32>
    %cst_15 = arith.constant dense<0.000000e+00> : vector<2x128xf32>
    %55 = tpu.matmul %52, %13, %cst_15 {dimension_numbers = #tpu.dot_dimension_numbers<[1], [0], [0], [1], [0, 0, 1, 1], [], []>} : vector<2x32xf32>, vector<32x128xf32>, vector<2x128xf32> -> vector<2x128xf32>
    %56 = arith.addf %54, %55 : vector<2x128xf32>
    %57 = math.tanh %56 : vector<2x128xf32>
    %58 = arith.negf %56 : vector<2x128xf32>
    %59 = math.exp %58 : vector<2x128xf32>
    %cst_16 = arith.constant 1.000000e+00 : f32
    %60 = vector.broadcast %cst_16 : f32 to vector<2x128xf32>
    %61 = arith.addf %60, %59 : vector<2x128xf32>
    %62 = arith.divf %60, %61 : vector<2x128xf32>
    %63 = arith.select %5, %57, %62 : vector<2x128xi1>, vector<2x128xf32>
    %64 = vector.extract_strided_slice %63 {offsets = [0, 0], sizes = [2, 32], strides = [1, 1]} : vector<2x128xf32> to vector<2x32xf32>
    %65 = vector.extract_strided_slice %63 {offsets = [0, 32], sizes = [2, 32], strides = [1, 1]} : vector<2x128xf32> to vector<2x32xf32>
    %66 = vector.extract_strided_slice %63 {offsets = [0, 64], sizes = [2, 32], strides = [1, 1]} : vector<2x128xf32> to vector<2x32xf32>
    %67 = vector.extract_strided_slice %63 {offsets = [0, 96], sizes = [2, 32], strides = [1, 1]} : vector<2x128xf32> to vector<2x32xf32>
    %68 = arith.mulf %65, %50 : vector<2x32xf32>
    %69 = arith.mulf %64, %66 : vector<2x32xf32>
    %70 = arith.addf %68, %69 : vector<2x32xf32>
    %71 = math.tanh %70 : vector<2x32xf32>
    %72 = arith.mulf %67, %71 : vector<2x32xf32>
    %c4 = arith.constant 4 : index
    %c0_17 = arith.constant 0 : index
    %73 = vector.load %arg10[%c4, %c0_17] : memref<16x32xf32, #tpu.memory_space<vmem>>, vector<2x32xf32>
    tpu.vector_store %arg10[%c4, %c0_17], %72 {strides = array<i32>} : memref<16x32xf32, #tpu.memory_space<vmem>>, vector<2x32xf32>,
    %74 = vector.extract_strided_slice %12 {offsets = [6, 0], sizes = [2, 128], strides = [1, 1]} : vector<16x128xf32> to vector<2x128xf32>
    %cst_18 = arith.constant dense<0.000000e+00> : vector<2x128xf32>
    %75 = tpu.matmul %72, %13, %cst_18 {dimension_numbers = #tpu.dot_dimension_numbers<[1], [0], [0], [1], [0, 0, 1, 1], [], []>} : vector<2x32xf32>, vector<32x128xf32>, vector<2x128xf32> -> vector<2x128xf32>
    %76 = arith.addf %74, %75 : vector<2x128xf32>
    %77 = math.tanh %76 : vector<2x128xf32>
    %78 = arith.negf %76 : vector<2x128xf32>
    %79 = math.exp %78 : vector<2x128xf32>
    %cst_19 = arith.constant 1.000000e+00 : f32
    %80 = vector.broadcast %cst_19 : f32 to vector<2x128xf32>
    %81 = arith.addf %80, %79 : vector<2x128xf32>
    %82 = arith.divf %80, %81 : vector<2x128xf32>
    %83 = arith.select %5, %77, %82 : vector<2x128xi1>, vector<2x128xf32>
    %84 = vector.extract_strided_slice %83 {offsets = [0, 0], sizes = [2, 32], strides = [1, 1]} : vector<2x128xf32> to vector<2x32xf32>
    %85 = vector.extract_strided_slice %83 {offsets = [0, 32], sizes = [2, 32], strides = [1, 1]} : vector<2x128xf32> to vector<2x32xf32>
    %86 = vector.extract_strided_slice %83 {offsets = [0, 64], sizes = [2, 32], strides = [1, 1]} : vector<2x128xf32> to vector<2x32xf32>
    %87 = vector.extract_strided_slice %83 {offsets = [0, 96], sizes = [2, 32], strides = [1, 1]} : vector<2x128xf32> to vector<2x32xf32>
    %88 = arith.mulf %85, %70 : vector<2x32xf32>
    %89 = arith.mulf %84, %86 : vector<2x32xf32>
    %90 = arith.addf %88, %89 : vector<2x32xf32>
    %91 = math.tanh %90 : vector<2x32xf32>
    %92 = arith.mulf %87, %91 : vector<2x32xf32>
    %c6 = arith.constant 6 : index
    %c0_20 = arith.constant 0 : index
    %93 = vector.load %arg10[%c6, %c0_20] : memref<16x32xf32, #tpu.memory_space<vmem>>, vector<2x32xf32>
    tpu.vector_store %arg10[%c6, %c0_20], %92 {strides = array<i32>} : memref<16x32xf32, #tpu.memory_space<vmem>>, vector<2x32xf32>,
    %94 = vector.extract_strided_slice %12 {offsets = [8, 0], sizes = [2, 128], strides = [1, 1]} : vector<16x128xf32> to vector<2x128xf32>
    %cst_21 = arith.constant dense<0.000000e+00> : vector<2x128xf32>
    %95 = tpu.matmul %92, %13, %cst_21 {dimension_numbers = #tpu.dot_dimension_numbers<[1], [0], [0], [1], [0, 0, 1, 1], [], []>} : vector<2x32xf32>, vector<32x128xf32>, vector<2x128xf32> -> vector<2x128xf32>
    %96 = arith.addf %94, %95 : vector<2x128xf32>
    %97 = math.tanh %96 : vector<2x128xf32>
    %98 = arith.negf %96 : vector<2x128xf32>
    %99 = math.exp %98 : vector<2x128xf32>
    %cst_22 = arith.constant 1.000000e+00 : f32
    %100 = vector.broadcast %cst_22 : f32 to vector<2x128xf32>
    %101 = arith.addf %100, %99 : vector<2x128xf32>
    %102 = arith.divf %100, %101 : vector<2x128xf32>
    %103 = arith.select %5, %97, %102 : vector<2x128xi1>, vector<2x128xf32>
    %104 = vector.extract_strided_slice %103 {offsets = [0, 0], sizes = [2, 32], strides = [1, 1]} : vector<2x128xf32> to vector<2x32xf32>
    %105 = vector.extract_strided_slice %103 {offsets = [0, 32], sizes = [2, 32], strides = [1, 1]} : vector<2x128xf32> to vector<2x32xf32>
    %106 = vector.extract_strided_slice %103 {offsets = [0, 64], sizes = [2, 32], strides = [1, 1]} : vector<2x128xf32> to vector<2x32xf32>
    %107 = vector.extract_strided_slice %103 {offsets = [0, 96], sizes = [2, 32], strides = [1, 1]} : vector<2x128xf32> to vector<2x32xf32>
    %108 = arith.mulf %105, %90 : vector<2x32xf32>
    %109 = arith.mulf %104, %106 : vector<2x32xf32>
    %110 = arith.addf %108, %109 : vector<2x32xf32>
    %111 = math.tanh %110 : vector<2x32xf32>
    %112 = arith.mulf %107, %111 : vector<2x32xf32>
    %c8 = arith.constant 8 : index
    %c0_23 = arith.constant 0 : index
    %113 = vector.load %arg10[%c8, %c0_23] : memref<16x32xf32, #tpu.memory_space<vmem>>, vector<2x32xf32>
    tpu.vector_store %arg10[%c8, %c0_23], %112 {strides = array<i32>} : memref<16x32xf32, #tpu.memory_space<vmem>>, vector<2x32xf32>,
    %114 = vector.extract_strided_slice %12 {offsets = [10, 0], sizes = [2, 128], strides = [1, 1]} : vector<16x128xf32> to vector<2x128xf32>
    %cst_24 = arith.constant dense<0.000000e+00> : vector<2x128xf32>
    %115 = tpu.matmul %112, %13, %cst_24 {dimension_numbers = #tpu.dot_dimension_numbers<[1], [0], [0], [1], [0, 0, 1, 1], [], []>} : vector<2x32xf32>, vector<32x128xf32>, vector<2x128xf32> -> vector<2x128xf32>
    %116 = arith.addf %114, %115 : vector<2x128xf32>
    %117 = math.tanh %116 : vector<2x128xf32>
    %118 = arith.negf %116 : vector<2x128xf32>
    %119 = math.exp %118 : vector<2x128xf32>
    %cst_25 = arith.constant 1.000000e+00 : f32
    %120 = vector.broadcast %cst_25 : f32 to vector<2x128xf32>
    %121 = arith.addf %120, %119 : vector<2x128xf32>
    %122 = arith.divf %120, %121 : vector<2x128xf32>
    %123 = arith.select %5, %117, %122 : vector<2x128xi1>, vector<2x128xf32>
    %124 = vector.extract_strided_slice %123 {offsets = [0, 0], sizes = [2, 32], strides = [1, 1]} : vector<2x128xf32> to vector<2x32xf32>
    %125 = vector.extract_strided_slice %123 {offsets = [0, 32], sizes = [2, 32], strides = [1, 1]} : vector<2x128xf32> to vector<2x32xf32>
    %126 = vector.extract_strided_slice %123 {offsets = [0, 64], sizes = [2, 32], strides = [1, 1]} : vector<2x128xf32> to vector<2x32xf32>
    %127 = vector.extract_strided_slice %123 {offsets = [0, 96], sizes = [2, 32], strides = [1, 1]} : vector<2x128xf32> to vector<2x32xf32>
    %128 = arith.mulf %125, %110 : vector<2x32xf32>
    %129 = arith.mulf %124, %126 : vector<2x32xf32>
    %130 = arith.addf %128, %129 : vector<2x32xf32>
    %131 = math.tanh %130 : vector<2x32xf32>
    %132 = arith.mulf %127, %131 : vector<2x32xf32>
    %c10 = arith.constant 10 : index
    %c0_26 = arith.constant 0 : index
    %133 = vector.load %arg10[%c10, %c0_26] : memref<16x32xf32, #tpu.memory_space<vmem>>, vector<2x32xf32>
    tpu.vector_store %arg10[%c10, %c0_26], %132 {strides = array<i32>} : memref<16x32xf32, #tpu.memory_space<vmem>>, vector<2x32xf32>,
    %134 = vector.extract_strided_slice %12 {offsets = [12, 0], sizes = [2, 128], strides = [1, 1]} : vector<16x128xf32> to vector<2x128xf32>
    %cst_27 = arith.constant dense<0.000000e+00> : vector<2x128xf32>
    %135 = tpu.matmul %132, %13, %cst_27 {dimension_numbers = #tpu.dot_dimension_numbers<[1], [0], [0], [1], [0, 0, 1, 1], [], []>} : vector<2x32xf32>, vector<32x128xf32>, vector<2x128xf32> -> vector<2x128xf32>
    %136 = arith.addf %134, %135 : vector<2x128xf32>
    %137 = math.tanh %136 : vector<2x128xf32>
    %138 = arith.negf %136 : vector<2x128xf32>
    %139 = math.exp %138 : vector<2x128xf32>
    %cst_28 = arith.constant 1.000000e+00 : f32
    %140 = vector.broadcast %cst_28 : f32 to vector<2x128xf32>
    %141 = arith.addf %140, %139 : vector<2x128xf32>
    %142 = arith.divf %140, %141 : vector<2x128xf32>
    %143 = arith.select %5, %137, %142 : vector<2x128xi1>, vector<2x128xf32>
    %144 = vector.extract_strided_slice %143 {offsets = [0, 0], sizes = [2, 32], strides = [1, 1]} : vector<2x128xf32> to vector<2x32xf32>
    %145 = vector.extract_strided_slice %143 {offsets = [0, 32], sizes = [2, 32], strides = [1, 1]} : vector<2x128xf32> to vector<2x32xf32>
    %146 = vector.extract_strided_slice %143 {offsets = [0, 64], sizes = [2, 32], strides = [1, 1]} : vector<2x128xf32> to vector<2x32xf32>
    %147 = vector.extract_strided_slice %143 {offsets = [0, 96], sizes = [2, 32], strides = [1, 1]} : vector<2x128xf32> to vector<2x32xf32>
    %148 = arith.mulf %145, %130 : vector<2x32xf32>
    %149 = arith.mulf %144, %146 : vector<2x32xf32>
    %150 = arith.addf %148, %149 : vector<2x32xf32>
    %151 = math.tanh %150 : vector<2x32xf32>
    %152 = arith.mulf %147, %151 : vector<2x32xf32>
    %c12 = arith.constant 12 : index
    %c0_29 = arith.constant 0 : index
    %153 = vector.load %arg10[%c12, %c0_29] : memref<16x32xf32, #tpu.memory_space<vmem>>, vector<2x32xf32>
    tpu.vector_store %arg10[%c12, %c0_29], %152 {strides = array<i32>} : memref<16x32xf32, #tpu.memory_space<vmem>>, vector<2x32xf32>,
    %154 = vector.extract_strided_slice %12 {offsets = [14, 0], sizes = [2, 128], strides = [1, 1]} : vector<16x128xf32> to vector<2x128xf32>
    %cst_30 = arith.constant dense<0.000000e+00> : vector<2x128xf32>
    %155 = tpu.matmul %152, %13, %cst_30 {dimension_numbers = #tpu.dot_dimension_numbers<[1], [0], [0], [1], [0, 0, 1, 1], [], []>} : vector<2x32xf32>, vector<32x128xf32>, vector<2x128xf32> -> vector<2x128xf32>
    %156 = arith.addf %154, %155 : vector<2x128xf32>
    %157 = math.tanh %156 : vector<2x128xf32>
    %158 = arith.negf %156 : vector<2x128xf32>
    %159 = math.exp %158 : vector<2x128xf32>
    %cst_31 = arith.constant 1.000000e+00 : f32
    %160 = vector.broadcast %cst_31 : f32 to vector<2x128xf32>
    %161 = arith.addf %160, %159 : vector<2x128xf32>
    %162 = arith.divf %160, %161 : vector<2x128xf32>
    %163 = arith.select %5, %157, %162 : vector<2x128xi1>, vector<2x128xf32>
    %164 = vector.extract_strided_slice %163 {offsets = [0, 0], sizes = [2, 32], strides = [1, 1]} : vector<2x128xf32> to vector<2x32xf32>
    %165 = vector.extract_strided_slice %163 {offsets = [0, 32], sizes = [2, 32], strides = [1, 1]} : vector<2x128xf32> to vector<2x32xf32>
    %166 = vector.extract_strided_slice %163 {offsets = [0, 64], sizes = [2, 32], strides = [1, 1]} : vector<2x128xf32> to vector<2x32xf32>
    %167 = vector.extract_strided_slice %163 {offsets = [0, 96], sizes = [2, 32], strides = [1, 1]} : vector<2x128xf32> to vector<2x32xf32>
    %168 = arith.mulf %165, %150 : vector<2x32xf32>
    %169 = arith.mulf %164, %166 : vector<2x32xf32>
    %170 = arith.addf %168, %169 : vector<2x32xf32>
    %171 = math.tanh %170 : vector<2x32xf32>
    %172 = arith.mulf %167, %171 : vector<2x32xf32>
    %c14 = arith.constant 14 : index
    %c0_32 = arith.constant 0 : index
    %173 = vector.load %arg10[%c14, %c0_32] : memref<16x32xf32, #tpu.memory_space<vmem>>, vector<2x32xf32>
    tpu.vector_store %arg10[%c14, %c0_32], %172 {strides = array<i32>} : memref<16x32xf32, #tpu.memory_space<vmem>>, vector<2x32xf32>,
    %c0_33 = arith.constant 0 : index
    %c0_34 = arith.constant 0 : index
    %174 = vector.load %arg10[%c0_33, %c0_34] : memref<16x32xf32, #tpu.memory_space<vmem>>, vector<16x32xf32>
    %c0_35 = arith.constant 0 : index
    %c0_36 = arith.constant 0 : index
    %175 = vector.load %arg4[%c0_35, %c0_36] : memref<32x128xf32, #tpu.memory_space<vmem>>, vector<32x128xf32>
    %cst_37 = arith.constant dense<0.000000e+00> : vector<16x128xf32>
    %176 = tpu.matmul %174, %175, %cst_37 {dimension_numbers = #tpu.dot_dimension_numbers<[1], [0], [0], [1], [0, 0, 1, 1], [], []>} : vector<16x32xf32>, vector<32x128xf32>, vector<16x128xf32> -> vector<16x128xf32>
    %c0_38 = arith.constant 0 : index
    %c0_39 = arith.constant 0 : index
    %177 = vector.load %arg6[%c0_38, %c0_39] : memref<1x128xf32, #tpu.memory_space<vmem>>, vector<1x128xf32>
    %178 = vector.broadcast %177 : vector<1x128xf32> to vector<16x128xf32>
    %179 = arith.addf %176, %178 : vector<16x128xf32>
    %c0_40 = arith.constant 0 : index
    %c0_41 = arith.constant 0 : index
    %180 = vector.load %arg5[%c0_40, %c0_41] : memref<32x128xf32, #tpu.memory_space<vmem>>, vector<32x128xf32>
    %181 = vector.extract_strided_slice %179 {offsets = [0, 0], sizes = [2, 128], strides = [1, 1]} : vector<16x128xf32> to vector<2x128xf32>
    %cst_42 = arith.constant dense<0.000000e+00> : vector<2x128xf32>
    %182 = tpu.matmul %6, %180, %cst_42 {dimension_numbers = #tpu.dot_dimension_numbers<[1], [0], [0], [1], [0, 0, 1, 1], [], []>} : vector<2x32xf32>, vector<32x128xf32>, vector<2x128xf32> -> vector<2x128xf32>
    %183 = arith.addf %181, %182 : vector<2x128xf32>
    %184 = math.tanh %183 : vector<2x128xf32>
    %185 = arith.negf %183 : vector<2x128xf32>
    %186 = math.exp %185 : vector<2x128xf32>
    %cst_43 = arith.constant 1.000000e+00 : f32
    %187 = vector.broadcast %cst_43 : f32 to vector<2x128xf32>
    %188 = arith.addf %187, %186 : vector<2x128xf32>
    %189 = arith.divf %187, %188 : vector<2x128xf32>
    %190 = arith.select %5, %184, %189 : vector<2x128xi1>, vector<2x128xf32>
    %191 = vector.extract_strided_slice %190 {offsets = [0, 0], sizes = [2, 32], strides = [1, 1]} : vector<2x128xf32> to vector<2x32xf32>
    %192 = vector.extract_strided_slice %190 {offsets = [0, 32], sizes = [2, 32], strides = [1, 1]} : vector<2x128xf32> to vector<2x32xf32>
    %193 = vector.extract_strided_slice %190 {offsets = [0, 64], sizes = [2, 32], strides = [1, 1]} : vector<2x128xf32> to vector<2x32xf32>
    %194 = vector.extract_strided_slice %190 {offsets = [0, 96], sizes = [2, 32], strides = [1, 1]} : vector<2x128xf32> to vector<2x32xf32>
    %195 = arith.mulf %192, %6 : vector<2x32xf32>
    %196 = arith.mulf %191, %193 : vector<2x32xf32>
    %197 = arith.addf %195, %196 : vector<2x32xf32>
    %198 = math.tanh %197 : vector<2x32xf32>
    %199 = arith.mulf %194, %198 : vector<2x32xf32>
    %200 = vector.extract_strided_slice %179 {offsets = [2, 0], sizes = [2, 128], strides = [1, 1]} : vector<16x128xf32> to vector<2x128xf32>
    %cst_44 = arith.constant dense<0.000000e+00> : vector<2x128xf32>
    %201 = tpu.matmul %199, %180, %cst_44 {dimension_numbers = #tpu.dot_dimension_numbers<[1], [0], [0], [1], [0, 0, 1, 1], [], []>} : vector<2x32xf32>, vector<32x128xf32>, vector<2x128xf32> -> vector<2x128xf32>
    %202 = arith.addf %200, %201 : vector<2x128xf32>
    %203 = math.tanh %202 : vector<2x128xf32>
    %204 = arith.negf %202 : vector<2x128xf32>
    %205 = math.exp %204 : vector<2x128xf32>
    %cst_45 = arith.constant 1.000000e+00 : f32
    %206 = vector.broadcast %cst_45 : f32 to vector<2x128xf32>
    %207 = arith.addf %206, %205 : vector<2x128xf32>
    %208 = arith.divf %206, %207 : vector<2x128xf32>
    %209 = arith.select %5, %203, %208 : vector<2x128xi1>, vector<2x128xf32>
    %210 = vector.extract_strided_slice %209 {offsets = [0, 0], sizes = [2, 32], strides = [1, 1]} : vector<2x128xf32> to vector<2x32xf32>
    %211 = vector.extract_strided_slice %209 {offsets = [0, 32], sizes = [2, 32], strides = [1, 1]} : vector<2x128xf32> to vector<2x32xf32>
    %212 = vector.extract_strided_slice %209 {offsets = [0, 64], sizes = [2, 32], strides = [1, 1]} : vector<2x128xf32> to vector<2x32xf32>
    %213 = vector.extract_strided_slice %209 {offsets = [0, 96], sizes = [2, 32], strides = [1, 1]} : vector<2x128xf32> to vector<2x32xf32>
    %214 = arith.mulf %211, %197 : vector<2x32xf32>
    %215 = arith.mulf %210, %212 : vector<2x32xf32>
    %216 = arith.addf %214, %215 : vector<2x32xf32>
    %217 = math.tanh %216 : vector<2x32xf32>
    %218 = arith.mulf %213, %217 : vector<2x32xf32>
    %219 = vector.extract_strided_slice %179 {offsets = [4, 0], sizes = [2, 128], strides = [1, 1]} : vector<16x128xf32> to vector<2x128xf32>
    %cst_46 = arith.constant dense<0.000000e+00> : vector<2x128xf32>
    %220 = tpu.matmul %218, %180, %cst_46 {dimension_numbers = #tpu.dot_dimension_numbers<[1], [0], [0], [1], [0, 0, 1, 1], [], []>} : vector<2x32xf32>, vector<32x128xf32>, vector<2x128xf32> -> vector<2x128xf32>
    %221 = arith.addf %219, %220 : vector<2x128xf32>
    %222 = math.tanh %221 : vector<2x128xf32>
    %223 = arith.negf %221 : vector<2x128xf32>
    %224 = math.exp %223 : vector<2x128xf32>
    %cst_47 = arith.constant 1.000000e+00 : f32
    %225 = vector.broadcast %cst_47 : f32 to vector<2x128xf32>
    %226 = arith.addf %225, %224 : vector<2x128xf32>
    %227 = arith.divf %225, %226 : vector<2x128xf32>
    %228 = arith.select %5, %222, %227 : vector<2x128xi1>, vector<2x128xf32>
    %229 = vector.extract_strided_slice %228 {offsets = [0, 0], sizes = [2, 32], strides = [1, 1]} : vector<2x128xf32> to vector<2x32xf32>
    %230 = vector.extract_strided_slice %228 {offsets = [0, 32], sizes = [2, 32], strides = [1, 1]} : vector<2x128xf32> to vector<2x32xf32>
    %231 = vector.extract_strided_slice %228 {offsets = [0, 64], sizes = [2, 32], strides = [1, 1]} : vector<2x128xf32> to vector<2x32xf32>
    %232 = vector.extract_strided_slice %228 {offsets = [0, 96], sizes = [2, 32], strides = [1, 1]} : vector<2x128xf32> to vector<2x32xf32>
    %233 = arith.mulf %230, %216 : vector<2x32xf32>
    %234 = arith.mulf %229, %231 : vector<2x32xf32>
    %235 = arith.addf %233, %234 : vector<2x32xf32>
    %236 = math.tanh %235 : vector<2x32xf32>
    %237 = arith.mulf %232, %236 : vector<2x32xf32>
    %238 = vector.extract_strided_slice %179 {offsets = [6, 0], sizes = [2, 128], strides = [1, 1]} : vector<16x128xf32> to vector<2x128xf32>
    %cst_48 = arith.constant dense<0.000000e+00> : vector<2x128xf32>
    %239 = tpu.matmul %237, %180, %cst_48 {dimension_numbers = #tpu.dot_dimension_numbers<[1], [0], [0], [1], [0, 0, 1, 1], [], []>} : vector<2x32xf32>, vector<32x128xf32>, vector<2x128xf32> -> vector<2x128xf32>
    %240 = arith.addf %238, %239 : vector<2x128xf32>
    %241 = math.tanh %240 : vector<2x128xf32>
    %242 = arith.negf %240 : vector<2x128xf32>
    %243 = math.exp %242 : vector<2x128xf32>
    %cst_49 = arith.constant 1.000000e+00 : f32
    %244 = vector.broadcast %cst_49 : f32 to vector<2x128xf32>
    %245 = arith.addf %244, %243 : vector<2x128xf32>
    %246 = arith.divf %244, %245 : vector<2x128xf32>
    %247 = arith.select %5, %241, %246 : vector<2x128xi1>, vector<2x128xf32>
    %248 = vector.extract_strided_slice %247 {offsets = [0, 0], sizes = [2, 32], strides = [1, 1]} : vector<2x128xf32> to vector<2x32xf32>
    %249 = vector.extract_strided_slice %247 {offsets = [0, 32], sizes = [2, 32], strides = [1, 1]} : vector<2x128xf32> to vector<2x32xf32>
    %250 = vector.extract_strided_slice %247 {offsets = [0, 64], sizes = [2, 32], strides = [1, 1]} : vector<2x128xf32> to vector<2x32xf32>
    %251 = vector.extract_strided_slice %247 {offsets = [0, 96], sizes = [2, 32], strides = [1, 1]} : vector<2x128xf32> to vector<2x32xf32>
    %252 = arith.mulf %249, %235 : vector<2x32xf32>
    %253 = arith.mulf %248, %250 : vector<2x32xf32>
    %254 = arith.addf %252, %253 : vector<2x32xf32>
    %255 = math.tanh %254 : vector<2x32xf32>
    %256 = arith.mulf %251, %255 : vector<2x32xf32>
    %257 = vector.extract_strided_slice %179 {offsets = [8, 0], sizes = [2, 128], strides = [1, 1]} : vector<16x128xf32> to vector<2x128xf32>
    %cst_50 = arith.constant dense<0.000000e+00> : vector<2x128xf32>
    %258 = tpu.matmul %256, %180, %cst_50 {dimension_numbers = #tpu.dot_dimension_numbers<[1], [0], [0], [1], [0, 0, 1, 1], [], []>} : vector<2x32xf32>, vector<32x128xf32>, vector<2x128xf32> -> vector<2x128xf32>
    %259 = arith.addf %257, %258 : vector<2x128xf32>
    %260 = math.tanh %259 : vector<2x128xf32>
    %261 = arith.negf %259 : vector<2x128xf32>
    %262 = math.exp %261 : vector<2x128xf32>
    %cst_51 = arith.constant 1.000000e+00 : f32
    %263 = vector.broadcast %cst_51 : f32 to vector<2x128xf32>
    %264 = arith.addf %263, %262 : vector<2x128xf32>
    %265 = arith.divf %263, %264 : vector<2x128xf32>
    %266 = arith.select %5, %260, %265 : vector<2x128xi1>, vector<2x128xf32>
    %267 = vector.extract_strided_slice %266 {offsets = [0, 0], sizes = [2, 32], strides = [1, 1]} : vector<2x128xf32> to vector<2x32xf32>
    %268 = vector.extract_strided_slice %266 {offsets = [0, 32], sizes = [2, 32], strides = [1, 1]} : vector<2x128xf32> to vector<2x32xf32>
    %269 = vector.extract_strided_slice %266 {offsets = [0, 64], sizes = [2, 32], strides = [1, 1]} : vector<2x128xf32> to vector<2x32xf32>
    %270 = vector.extract_strided_slice %266 {offsets = [0, 96], sizes = [2, 32], strides = [1, 1]} : vector<2x128xf32> to vector<2x32xf32>
    %271 = arith.mulf %268, %254 : vector<2x32xf32>
    %272 = arith.mulf %267, %269 : vector<2x32xf32>
    %273 = arith.addf %271, %272 : vector<2x32xf32>
    %274 = math.tanh %273 : vector<2x32xf32>
    %275 = arith.mulf %270, %274 : vector<2x32xf32>
    %276 = vector.extract_strided_slice %179 {offsets = [10, 0], sizes = [2, 128], strides = [1, 1]} : vector<16x128xf32> to vector<2x128xf32>
    %cst_52 = arith.constant dense<0.000000e+00> : vector<2x128xf32>
    %277 = tpu.matmul %275, %180, %cst_52 {dimension_numbers = #tpu.dot_dimension_numbers<[1], [0], [0], [1], [0, 0, 1, 1], [], []>} : vector<2x32xf32>, vector<32x128xf32>, vector<2x128xf32> -> vector<2x128xf32>
    %278 = arith.addf %276, %277 : vector<2x128xf32>
    %279 = math.tanh %278 : vector<2x128xf32>
    %280 = arith.negf %278 : vector<2x128xf32>
    %281 = math.exp %280 : vector<2x128xf32>
    %cst_53 = arith.constant 1.000000e+00 : f32
    %282 = vector.broadcast %cst_53 : f32 to vector<2x128xf32>
    %283 = arith.addf %282, %281 : vector<2x128xf32>
    %284 = arith.divf %282, %283 : vector<2x128xf32>
    %285 = arith.select %5, %279, %284 : vector<2x128xi1>, vector<2x128xf32>
    %286 = vector.extract_strided_slice %285 {offsets = [0, 0], sizes = [2, 32], strides = [1, 1]} : vector<2x128xf32> to vector<2x32xf32>
    %287 = vector.extract_strided_slice %285 {offsets = [0, 32], sizes = [2, 32], strides = [1, 1]} : vector<2x128xf32> to vector<2x32xf32>
    %288 = vector.extract_strided_slice %285 {offsets = [0, 64], sizes = [2, 32], strides = [1, 1]} : vector<2x128xf32> to vector<2x32xf32>
    %289 = vector.extract_strided_slice %285 {offsets = [0, 96], sizes = [2, 32], strides = [1, 1]} : vector<2x128xf32> to vector<2x32xf32>
    %290 = arith.mulf %287, %273 : vector<2x32xf32>
    %291 = arith.mulf %286, %288 : vector<2x32xf32>
    %292 = arith.addf %290, %291 : vector<2x32xf32>
    %293 = math.tanh %292 : vector<2x32xf32>
    %294 = arith.mulf %289, %293 : vector<2x32xf32>
    %295 = vector.extract_strided_slice %179 {offsets = [12, 0], sizes = [2, 128], strides = [1, 1]} : vector<16x128xf32> to vector<2x128xf32>
    %cst_54 = arith.constant dense<0.000000e+00> : vector<2x128xf32>
    %296 = tpu.matmul %294, %180, %cst_54 {dimension_numbers = #tpu.dot_dimension_numbers<[1], [0], [0], [1], [0, 0, 1, 1], [], []>} : vector<2x32xf32>, vector<32x128xf32>, vector<2x128xf32> -> vector<2x128xf32>
    %297 = arith.addf %295, %296 : vector<2x128xf32>
    %298 = math.tanh %297 : vector<2x128xf32>
    %299 = arith.negf %297 : vector<2x128xf32>
    %300 = math.exp %299 : vector<2x128xf32>
    %cst_55 = arith.constant 1.000000e+00 : f32
    %301 = vector.broadcast %cst_55 : f32 to vector<2x128xf32>
    %302 = arith.addf %301, %300 : vector<2x128xf32>
    %303 = arith.divf %301, %302 : vector<2x128xf32>
    %304 = arith.select %5, %298, %303 : vector<2x128xi1>, vector<2x128xf32>
    %305 = vector.extract_strided_slice %304 {offsets = [0, 0], sizes = [2, 32], strides = [1, 1]} : vector<2x128xf32> to vector<2x32xf32>
    %306 = vector.extract_strided_slice %304 {offsets = [0, 32], sizes = [2, 32], strides = [1, 1]} : vector<2x128xf32> to vector<2x32xf32>
    %307 = vector.extract_strided_slice %304 {offsets = [0, 64], sizes = [2, 32], strides = [1, 1]} : vector<2x128xf32> to vector<2x32xf32>
    %308 = vector.extract_strided_slice %304 {offsets = [0, 96], sizes = [2, 32], strides = [1, 1]} : vector<2x128xf32> to vector<2x32xf32>
    %309 = arith.mulf %306, %292 : vector<2x32xf32>
    %310 = arith.mulf %305, %307 : vector<2x32xf32>
    %311 = arith.addf %309, %310 : vector<2x32xf32>
    %312 = math.tanh %311 : vector<2x32xf32>
    %313 = arith.mulf %308, %312 : vector<2x32xf32>
    %314 = vector.extract_strided_slice %179 {offsets = [14, 0], sizes = [2, 128], strides = [1, 1]} : vector<16x128xf32> to vector<2x128xf32>
    %cst_56 = arith.constant dense<0.000000e+00> : vector<2x128xf32>
    %315 = tpu.matmul %313, %180, %cst_56 {dimension_numbers = #tpu.dot_dimension_numbers<[1], [0], [0], [1], [0, 0, 1, 1], [], []>} : vector<2x32xf32>, vector<32x128xf32>, vector<2x128xf32> -> vector<2x128xf32>
    %316 = arith.addf %314, %315 : vector<2x128xf32>
    %317 = math.tanh %316 : vector<2x128xf32>
    %318 = arith.negf %316 : vector<2x128xf32>
    %319 = math.exp %318 : vector<2x128xf32>
    %cst_57 = arith.constant 1.000000e+00 : f32
    %320 = vector.broadcast %cst_57 : f32 to vector<2x128xf32>
    %321 = arith.addf %320, %319 : vector<2x128xf32>
    %322 = arith.divf %320, %321 : vector<2x128xf32>
    %323 = arith.select %5, %317, %322 : vector<2x128xi1>, vector<2x128xf32>
    %324 = vector.extract_strided_slice %323 {offsets = [0, 0], sizes = [2, 32], strides = [1, 1]} : vector<2x128xf32> to vector<2x32xf32>
    %325 = vector.extract_strided_slice %323 {offsets = [0, 32], sizes = [2, 32], strides = [1, 1]} : vector<2x128xf32> to vector<2x32xf32>
    %326 = vector.extract_strided_slice %323 {offsets = [0, 64], sizes = [2, 32], strides = [1, 1]} : vector<2x128xf32> to vector<2x32xf32>
    %327 = vector.extract_strided_slice %323 {offsets = [0, 96], sizes = [2, 32], strides = [1, 1]} : vector<2x128xf32> to vector<2x32xf32>
    %328 = arith.mulf %325, %311 : vector<2x32xf32>
    %329 = arith.mulf %324, %326 : vector<2x32xf32>
    %330 = arith.addf %328, %329 : vector<2x32xf32>
    %331 = math.tanh %330 : vector<2x32xf32>
    %332 = arith.mulf %327, %331 : vector<2x32xf32>
    %c0_58 = arith.constant 0 : index
    %c0_59 = arith.constant 0 : index
    %333 = vector.load %arg7[%c0_58, %c0_59] : memref<32x5xf32, #tpu.memory_space<vmem>>, vector<32x5xf32>
    %cst_60 = arith.constant dense<0.000000e+00> : vector<2x5xf32>
    %334 = tpu.matmul %332, %333, %cst_60 {dimension_numbers = #tpu.dot_dimension_numbers<[1], [0], [0], [1], [0, 0, 1, 1], [], []>} : vector<2x32xf32>, vector<32x5xf32>, vector<2x5xf32> -> vector<2x5xf32>
    %c0_61 = arith.constant 0 : index
    %c0_62 = arith.constant 0 : index
    %335 = vector.load %arg8[%c0_61, %c0_62] : memref<1x5xf32, #tpu.memory_space<vmem>>, vector<1x5xf32>
    %336 = vector.broadcast %335 : vector<1x5xf32> to vector<2x5xf32>
    %337 = arith.addf %334, %336 : vector<2x5xf32>
    %c0_63 = arith.constant 0 : index
    %c0_64 = arith.constant 0 : index
    %338 = vector.load %arg9[%c0_63, %c0_64] : memref<2x5xf32, #tpu.memory_space<vmem>>, vector<2x5xf32>
    tpu.vector_store %arg9[%c0_63, %c0_64], %337 {strides = array<i32>} : memref<2x5xf32, #tpu.memory_space<vmem>>, vector<2x5xf32>,
    return
  }
}

</mosaic_0001>

<bundles_post_ra>
// kernel: stock_lstm_forward.1
= control target key start
LH: loop header
LB: loop body
LE: loop exit
PB: predicated region body
PF: predicated region fallthrough
CT: control target
= control target key end

     0   :  { %14 = vsyncpa [#allocation4], 0  ;;  %s3131_s0 = inlined_call_operand.vmem [shape: f32[16,8], index: 0, kind: input, shape index: {}]   ;;  %s3132_s1 = inlined_call_operand.vmem [shape: f32[8,128], index: 1, kind: input, shape index: {}]   ;;  %s3133_s2 = inlined_call_operand.vmem [shape: f32[32,128], index: 2, kind: input, shape index: {}]   ;;  %s3134_s3 = inlined_call_operand.vmem [shape: f32[1,128], index: 3, kind: input, shape index: {}]   ;;  %s3135_s4 = inlined_call_operand.vmem [shape: f32[32,128], index: 4, kind: input, shape index: {}]   ;;  %s3136_s5 = inlined_call_operand.vmem [shape: f32[32,128], index: 5, kind: input, shape index: {}]   ;;  %s3137_s6 = inlined_call_operand.vmem [shape: f32[1,128], index: 6, kind: input, shape index: {}]   ;;  %s3138_s7 = inlined_call_operand.vmem [shape: f32[32,5], index: 7, kind: input, shape index: {}]   ;;  %s3139_s8 = inlined_call_operand.hbm [shape: f32[1,5], index: 8, kind: input, shape index: {}]   ;;  %s3140_s9 = inlined_call_operand.hbm [shape: f32[2,5], index: 9, kind: output, shape index: {}]  }
   0x1   :  { %15 = vsyncpa [#allocation5], 0  ;;  %s2707_s30 = smov [#allocation3]   ;;  %s2659_s13 = scalar_lea.hbm %s3139_s8, 16 }
   0x2   :  { %s38_s10 = sshll.u32 %s2707_s30, 4  ;;  %p2660_p0 = scmp.ne.s32.totalorder %s3139_s8, %s2659_s13  ;;  %s39_s10 = int_to_ptr.vmem [resolvable:$true] %s38_s10 }
   0x3   :  { %p2663_p1 = scmp.lt.u32.totalorder %s2659_s13, %s3139_s8 }
   0x5   :  { %p2665_p2 = pnand %p2663_p1, %p2660_p0 }
   0x7   :  { %2668 = shalt.err (!%p2665_p2)
}
   0x8   :  { %s2669_s18 = scalar_lea.vmem %s39_s10, 16  ;;  %s2673_s19 = scalar_lea.vmem %s39_s10, 32 }
   0x9   :  { %p2670_p3 = scmp.ne.s32.totalorder %s39_s10, %s2669_s18  ;;  %p2674_p4 = scmp.lt.s32.totalorder %s39_s10, %s39_s10 }
   0xa   :  { %p2675_p5 = scmp.lt.s32.totalorder %s2673_s19, %s2669_s18 }
   0xc   :  { %p2676_p6 = por %p2675_p5, %p2674_p4 }
   0xe   :  { %p2677_p7 = pnand %p2676_p6, %p2670_p3 }
  0x10   :  { %2680 = shalt.err (!%p2677_p7)
}
  0x11   :  { %41 = dma.hbm_to_vmem [thread:$0]  %s3139_s8, 16, %s39_s10, [#allocation4]  }
  0x12   :  { %2703 = dma.done.wait [#allocation4], 16  }
  0x13   :  { %2704 = vsyncadd [#allocation4], 4294967280  ;;  %v2708_v0 = vmov 0.0|0.0   ;;  %vm2709_vm0 = vmmov 0   ;;  %v2710_v1 = vmov 0.0   ;;  %vm60_vm1 = vcmask 64512  }
  0x14   :  { %2414 = vmatprep.subr.bf16.mxu1 %v2708_v0  ;;  %2224 = vmatprep.mubr.msk.f32.mxu1 %vm2709_vm0, %v2710_v1  ;;  %v142_v2 = vld [vmem:[%s3133_s2] sm:$0xff]  ;;  %v143_v3 = vld [vmem:[%s3133_s2 + $0x8] sm:$0xff]  ;;  %v144_v8 = vld [vmem:[%s3133_s2 + $0x10] sm:$0xff]  ;;  %v45_v21 = vlaneseq  ;;  %vm250_vm5 = vcmask 254976   ;;  %vm146_vm6 = vcmask 261120   ;;  %vm360_vm7 = vcmask 257026  }
  0x15   :  { %v52_v4 = vld [vmem:[%s3132_s1] sm:$0xff]  ;;  %v2788_v5 = vpack.c.bf16 %v143_v3, %v142_v2  ;;  %v51_v7 = vld [vmem:[%s3131_s0 + $0x8] sm:$0xff]  ;;  %v145_v9 = vld [vmem:[%s3133_s2 + $0x18] sm:$0xff]  ;;  %s2711_s2 = smov 64   ;;  %vm586_vm8 = vcmask 261126   ;;  %vm473_vm9 = vcmask 259076  }
  0x16   :  { %2211 = vmatprep.subr.mxu0 %v52_v4  ;;  %v50_v6 = vld [vmem:[%s3131_s0] sm:$0xff]  ;;  %v2803_v10 = vpack.c.bf16 %v145_v9, %v144_v8  ;;  %v46_v23 = vand.u32 127, %v45_v21  ;;  %v1976_v24 = vld [vmem:[%s3138_s7 + $0x8] sm:$0xff]  ;;  %s2713_s1 = smov [#allocation6]   ;;  %vm2062_vm10 = vcmask 33792  }
  0x17   :  { %2212 = vmatpush3.msra.mxu0 %v52_v4  ;;  %2213 = vmatprep.mubr.msk.f32.mxu0 %vm60_vm1, %v50_v6  ;;  %v2079_v11 = vld [vmem:[%s3134_s3] ss:$0 sm:$0xff]  ;;  %s2712_s3 = smov 32   ;;  %s2070_s14 = sshll.u32 %s2713_s1, 4  ;;  %s2071_s14 = int_to_ptr.vmem [resolvable:$true] %s2070_s14 }
  0x18   :  { %2416 = vmatpush3.bf16.msra.mxu1 %v2788_v5  ;;  %2214 = vmatmul.mubr.msk.f32.vlgmr.msra.gmra.mrb[0].mxu0 %vm60_vm1, %v51_v7  ;;  %vm47_vm2 = vcmp.ge.s32.totalorder %v46_v23, 64  ;;  %vm48_vm3 = vcmp.lt.s32.totalorder %v46_v23, 96  ;;  %p2686_p9 = scmp.lt.s32.totalorder %s2071_s14, %s2071_s14 }
  0x19   :  { %2417 = vmatprep.subr.bf16.mxu1 %v2708_v0  ;;  %2420 = vmatprep.subr.bf16.mxu0 %v2708_v0  ;;  %vm2830_vm4 = vmand %vm47_vm2, %vm48_vm3 }
  0x1a   :  { %2422 = vmatpush3.bf16.msra.mxu0 %v2788_v5  ;;  %2235 = vmatprep.mubr.msk.f32.mxu0 %vm2709_vm0, %v2710_v1 }
  0x1b   :  { %2423 = vmatprep.subr.bf16.mxu0 %v2708_v0 }
  0x1c   :  { %2419 = vmatpush3.bf16.msra.mxu1 %v2803_v10 }
  0x1d   :  { %2426 = vmatprep.subr.bf16.mxu1 %v2708_v0 }
  0x1e   :  { %2425 = vmatpush3.bf16.msra.mxu0 %v2803_v10 }
  0x1f   :  { %2225 = vmatmul.mubr.f32.vlgmr.msra.gmra.mrb[0].mxu1 %v2710_v1  ;;  %2432 = vmatprep.subr.bf16.mxu0 %v2708_v0 }
  0x20   :  { %2428 = vmatpush3.bf16.msra.mxu1 %v2788_v5  ;;  %2246 = vmatprep.mubr.msk.f32.mxu1 %vm2709_vm0, %v2710_v1 }
  0x21   :  { %2429 = vmatprep.subr.bf16.mxu1 %v2708_v0 }
  0x24   :  { %2431 = vmatpush3.bf16.msra.mxu1 %v2803_v10 }
  0x25   :  { %2438 = vmatprep.subr.bf16.mxu1 %v2708_v0 }
  0xeb   :  { %v2215_v12 = vpop.f32.mrb[0].mxu0 }
  0xec   :  { %v2825_v13 = vadd.f32 %v2215_v12, %v2079_v11  ;;  %v133_v14 = vpop.f32.mrb[1].mxu0 }
  0xed   :  { %v2827_v15 = vadd.f32 %v2079_v11, %v133_v14 }
  0xf2   :  { %v216_v16 = vpop.f32.mrb[0].mxu1 }
  0xf3   :  { %v220_v17 = vadd.f32 %v216_v16, %v2827_v15  ;;  %v2226_v18 = vpop.f32.mrb[1].mxu1 }
  0xf5   :  { %v2082_v19 = vmul.f32 -1.442695, %v220_v17 }
  0xf7   :  { %2531 = vpow2.f32 %v2082_v19 }
  0xf8   :  { %2533 = vtanh.f32 %v220_v17 }
 0x101   :  { %v2532_v20 = vpop.eup %2531 }
 0x102   :  { %v225_v22 = vadd.f32 1.0, %v2532_v20  ;;  %v2534_v25 = vpop.eup %2533 }
 0x104   :  { %2535 = vrcp.f32 %v225_v22 }
 0x10e   :  { %v2536_v26 = vpop.eup %2535 }
 0x10f   :  { %v228_v27 = vsel %vm2830_vm4, %v2534_v25, %v2536_v26 }
 0x110   :  { %231 = vrot.lane.b32.xlu0 %v228_v27, %s2711_s2  ;;  %v229_v30 = vmul.f32 0.0, %v228_v27 }
 0x182   :  { %v232_v28 = vpop.permute.xlu0 %231 }
 0x183   :  { %v234_v29 = vmul.f32 %v232_v28, %v228_v27 }
 0x185   :  { %236 = vrot.lane.b32.xlu0 %v234_v29, %s2712_s3 }
 0x1f7   :  { %v237_v31 = vpop.permute.xlu0 %236 }
 0x1f8   :  { %v239_v32 = vadd.f32 %v237_v31, %v229_v30 }
 0x1fa   :  { %2537 = vtanh.f32 %v239_v32  ;;  %v337_v49 = vrot.slane %v239_v32, 6 }
 0x204   :  { %v2538_v33 = vpop.eup %2537 }
 0x205   :  { %242 = vrot.lane.b32.xlu1 %v2538_v33, %s2711_s2 }
 0x277   :  { %v243_v34 = vpop.permute.xlu1 %242 }
 0x278   :  { %v245_v35 = vmul.f32 %v243_v34, %v228_v27 }
 0x27a   :  { %247 = vrot.lane.b32.xlu1 %v245_v35, %s2712_s3 }
 0x2ec   :  { %v248_v36 = vpop.permute.xlu1 %247 }
 0x2ed   :  { %251 = vst.msk [vmem:[#allocation2] sm:$0x3] %vm250_vm5, %v248_v36  ;;  %2236 = vmatmul.mubr.msk.f32.vlgmr.msra.gmra.mrb[2].mxu0 %vm146_vm6, %v248_v36 }
 0x2ee   :  { %2434 = vmatpush3.bf16.msra.mxu0 %v2788_v5  ;;  %2257 = vmatprep.mubr.msk.f32.mxu0 %vm2709_vm0, %v2710_v1 }
 0x2ef   :  { %2435 = vmatprep.subr.bf16.mxu0 %v2708_v0 }
 0x2f2   :  { %2437 = vmatpush3.bf16.msra.mxu0 %v2803_v10 }
 0x2f3   :  { %2444 = vmatprep.subr.bf16.mxu0 %v2708_v0 }
 0x3c0   :  { %v320_v37 = vpop.f32.mrb[2].mxu0 }
 0x3c1   :  { %v325_v38 = vrot.slane %v320_v37, 6  ;;  %v2237_v39 = vpop.f32.mrb[3].mxu0 }
 0x3c3   :  { %v327_v40 = vadd.f32 %v325_v38, %v2827_v15 }
 0x3c5   :  { %v2084_v41 = vmul.f32 -1.442695, %v327_v40 }
 0x3c7   :  { %2539 = vpow2.f32 %v2084_v41 }
 0x3c8   :  { %2541 = vtanh.f32 %v327_v40 }
 0x3d1   :  { %v2540_v42 = vpop.eup %2539 }
 0x3d2   :  { %v332_v43 = vadd.f32 1.0, %v2540_v42  ;;  %v2542_v44 = vpop.eup %2541 }
 0x3d4   :  { %2543 = vrcp.f32 %v332_v43 }
 0x3de   :  { %v2544_v45 = vpop.eup %2543 }
 0x3df   :  { %v335_v46 = vsel %vm2830_vm4, %v2542_v44, %v2544_v45 }
 0x3e0   :  { %341 = vrot.lane.b32.xlu0 %v335_v46, %s2711_s2  ;;  %v339_v50 = vmul.f32 %v337_v49, %v335_v46 }
 0x452   :  { %v342_v47 = vpop.permute.xlu0 %341 }
 0x453   :  { %v344_v48 = vmul.f32 %v342_v47, %v335_v46 }
 0x455   :  { %346 = vrot.lane.b32.xlu1 %v344_v48, %s2712_s3 }
 0x4c7   :  { %v347_v51 = vpop.permute.xlu1 %346 }
 0x4c8   :  { %v349_v52 = vadd.f32 %v347_v51, %v339_v50 }
 0x4ca   :  { %2545 = vtanh.f32 %v349_v52  ;;  %v450_v9 = vrot.slane %v349_v52, 6 }
 0x4d4   :  { %v2546_v53 = vpop.eup %2545 }
 0x4d5   :  { %352 = vrot.lane.b32.xlu0 %v2546_v53, %s2711_s2 }
 0x547   :  { %v353_v54 = vpop.permute.xlu0 %352 }
 0x548   :  { %v2854_v55 = vmul.f32 %v353_v54, %v335_v46 }
 0x54a   :  { %v362_v56 = vrot.slane %v2854_v55, 2 }
 0x54c   :  { %363 = vrot.lane.b32.xlu1 %v362_v56, %s2712_s3 }
 0x5be   :  { %v364_v57 = vpop.permute.xlu1 %363 }
 0x5bf   :  { %2247 = vmatmul.mubr.msk.f32.vlgmr.msra.gmra.mrb[2].mxu1 %vm146_vm6, %v364_v57 }
 0x5c0   :  { %2440 = vmatpush3.bf16.msra.mxu1 %v2788_v5  ;;  %2268 = vmatprep.mubr.msk.f32.mxu1 %vm2709_vm0, %v2710_v1 }
 0x5c1   :  { %2441 = vmatprep.subr.bf16.mxu1 %v2708_v0 }
 0x5c4   :  { %2443 = vmatpush3.bf16.msra.mxu1 %v2803_v10 }
 0x5c5   :  { %2450 = vmatprep.subr.bf16.mxu1 %v2708_v0 }
 0x692   :  { %v433_v58 = vpop.f32.mrb[2].mxu1 }
 0x693   :  { %v438_v59 = vrot.slane %v433_v58, 4  ;;  %v2248_v60 = vpop.f32.mrb[3].mxu1 }
 0x695   :  { %v440_v61 = vadd.f32 %v438_v59, %v2827_v15 }
 0x697   :  { %v2086_v62 = vmul.f32 -1.442695, %v440_v61 }
 0x699   :  { %2547 = vpow2.f32 %v2086_v62 }
 0x69a   :  { %2549 = vtanh.f32 %v440_v61 }
 0x6a3   :  { %v2548_v63 = vpop.eup %2547 }
 0x6a4   :  { %v445_v2 = vadd.f32 1.0, %v2548_v63  ;;  %v2550_v3 = vpop.eup %2549 }
 0x6a6   :  { %2551 = vrcp.f32 %v445_v2 }
 0x6b0   :  { %v2552_v4 = vpop.eup %2551 }
 0x6b1   :  { %v448_v6 = vsel %vm2830_vm4, %v2550_v3, %v2552_v4 }
 0x6b2   :  { %454 = vrot.lane.b32.xlu0 %v448_v6, %s2711_s2  ;;  %v452_v11 = vmul.f32 %v450_v9, %v448_v6 }
 0x724   :  { %v455_v7 = vpop.permute.xlu0 %454 }
 0x725   :  { %v457_v8 = vmul.f32 %v455_v7, %v448_v6 }
 0x727   :  { %459 = vrot.lane.b32.xlu1 %v457_v8, %s2712_s3 }
 0x799   :  { %v460_v12 = vpop.permute.xlu1 %459 }
 0x79a   :  { %v462_v14 = vadd.f32 %v460_v12, %v452_v11 }
 0x79c   :  { %2553 = vtanh.f32 %v462_v14  ;;  %v563_v34 = vrot.slane %v462_v14, 6 }
 0x7a6   :  { %v2554_v16 = vpop.eup %2553 }
 0x7a7   :  { %465 = vrot.lane.b32.xlu0 %v2554_v16, %s2711_s2 }
 0x819   :  { %v466_v17 = vpop.permute.xlu0 %465 }
 0x81a   :  { %v2871_v18 = vmul.f32 %v466_v17, %v448_v6 }
 0x81c   :  { %v475_v19 = vrot.slane %v2871_v18, 4 }
 0x81e   :  { %476 = vrot.lane.b32.xlu1 %v475_v19, %s2712_s3 }
 0x890   :  { %v477_v20 = vpop.permute.xlu1 %476 }
 0x891   :  { %2258 = vmatmul.mubr.msk.f32.vlgmr.msra.gmra.mrb[4].mxu0 %vm146_vm6, %v477_v20 }
 0x892   :  { %2446 = vmatpush3.bf16.msra.mxu0 %v2788_v5  ;;  %2279 = vmatprep.mubr.msk.f32.mxu0 %vm2709_vm0, %v2710_v1 }
 0x893   :  { %2447 = vmatprep.subr.bf16.mxu0 %v2708_v0 }
 0x896   :  { %2449 = vmatpush3.bf16.msra.mxu0 %v2803_v10 }
 0x897   :  { %2456 = vmatprep.subr.bf16.mxu0 %v2708_v0 }
 0x964   :  { %v546_v21 = vpop.f32.mrb[4].mxu0 }
 0x965   :  { %v551_v22 = vrot.slane %v546_v21, 2  ;;  %v2259_v23 = vpop.f32.mrb[5].mxu0 }
 0x967   :  { %v553_v25 = vadd.f32 %v551_v22, %v2827_v15 }
 0x969   :  { %v2088_v26 = vmul.f32 -1.442695, %v553_v25 }
 0x96b   :  { %2555 = vpow2.f32 %v2088_v26 }
 0x96c   :  { %2557 = vtanh.f32 %v553_v25 }
 0x975   :  { %v2556_v27 = vpop.eup %2555 }
 0x976   :  { %v558_v28 = vadd.f32 1.0, %v2556_v27  ;;  %v2558_v29 = vpop.eup %2557 }
 0x978   :  { %2559 = vrcp.f32 %v558_v28 }
 0x982   :  { %v2560_v30 = vpop.eup %2559 }
 0x983   :  { %v561_v31 = vsel %vm2830_vm4, %v2558_v29, %v2560_v30 }
 0x984   :  { %567 = vrot.lane.b32.xlu0 %v561_v31, %s2711_s2  ;;  %v565_v35 = vmul.f32 %v563_v34, %v561_v31 }
 0x9f6   :  { %v568_v32 = vpop.permute.xlu0 %567 }
 0x9f7   :  { %v570_v33 = vmul.f32 %v568_v32, %v561_v31 }
 0x9f9   :  { %572 = vrot.lane.b32.xlu1 %v570_v33, %s2712_s3 }
 0xa6b   :  { %v573_v15 = vpop.permute.xlu1 %572 }
 0xa6c   :  { %v575_v36 = vadd.f32 %v573_v15, %v565_v35 }
 0xa6e   :  { %2561 = vtanh.f32 %v575_v36  ;;  %v673_v53 = vrot.slane %v575_v36, 6 }
 0xa78   :  { %v2562_v37 = vpop.eup %2561 }
 0xa79   :  { %578 = vrot.lane.b32.xlu0 %v2562_v37, %s2711_s2 }
 0xaeb   :  { %v579_v38 = vpop.permute.xlu0 %578 }
 0xaec   :  { %v2888_v39 = vmul.f32 %v579_v38, %v561_v31 }
 0xaee   :  { %v588_v40 = vrot.slane %v2888_v39, 6 }
 0xaf0   :  { %589 = vrot.lane.b32.xlu1 %v588_v40, %s2712_s3 }
 0xb62   :  { %v590_v41 = vpop.permute.xlu1 %589 }
 0xb63   :  { %2269 = vmatmul.mubr.msk.f32.vlgmr.msra.gmra.mrb[4].mxu1 %vm146_vm6, %v590_v41 }
 0xb64   :  { %2452 = vmatpush3.bf16.msra.mxu1 %v2788_v5  ;;  %2290 = vmatprep.mubr.msk.f32.mxu1 %vm2709_vm0, %v2710_v1 }
 0xb65   :  { %2453 = vmatprep.subr.bf16.mxu1 %v2708_v0 }
 0xb68   :  { %2455 = vmatpush3.bf16.msra.mxu1 %v2803_v10 }
 0xc36   :  { %v659_v42 = vpop.f32.mrb[4].mxu1 }
 0xc37   :  { %v663_v43 = vadd.f32 %v659_v42, %v2825_v13  ;;  %v2270_v44 = vpop.f32.mrb[5].mxu1 }
 0xc39   :  { %v2090_v45 = vmul.f32 -1.442695, %v663_v43 }
 0xc3b   :  { %2563 = vpow2.f32 %v2090_v45 }
 0xc3c   :  { %2565 = vtanh.f32 %v663_v43 }
 0xc45   :  { %v2564_v46 = vpop.eup %2563 }
 0xc46   :  { %v668_v47 = vadd.f32 1.0, %v2564_v46  ;;  %v2566_v48 = vpop.eup %2565 }
 0xc48   :  { %2567 = vrcp.f32 %v668_v47 }
 0xc52   :  { %v2568_v49 = vpop.eup %2567 }
 0xc53   :  { %v671_v50 = vsel %vm2830_vm4, %v2566_v48, %v2568_v49 }
 0xc54   :  { %677 = vrot.lane.b32.xlu0 %v671_v50, %s2711_s2  ;;  %v675_v54 = vmul.f32 %v673_v53, %v671_v50 }
 0xcc6   :  { %v678_v51 = vpop.permute.xlu0 %677 }
 0xcc7   :  { %v680_v52 = vmul.f32 %v678_v51, %v671_v50 }
 0xcc9   :  { %682 = vrot.lane.b32.xlu1 %v680_v52, %s2712_s3 }
 0xd3b   :  { %v683_v56 = vpop.permute.xlu1 %682 }
 0xd3c   :  { %v685_v57 = vadd.f32 %v683_v56, %v675_v54 }
 0xd3e   :  { %2569 = vtanh.f32 %v685_v57  ;;  %v782_v12 = vrot.slane %v685_v57, 6 }
 0xd48   :  { %v2570_v58 = vpop.eup %2569 }
 0xd49   :  { %688 = vrot.lane.b32.xlu0 %v2570_v58, %s2711_s2 }
 0xdbb   :  { %v689_v59 = vpop.permute.xlu0 %688 }
 0xdbc   :  { %v691_v60 = vmul.f32 %v689_v59, %v671_v50 }
 0xdbe   :  { %693 = vrot.lane.b32.xlu1 %v691_v60, %s2712_s3 }
 0xe30   :  { %v694_v61 = vpop.permute.xlu1 %693 }
 0xe31   :  { %696 = vst.msk [vmem:[#allocation2 + $0x8] sm:$0x3] %vm250_vm5, %v694_v61  ;;  %2280 = vmatmul.mubr.msk.f32.vlgmr.msra.gmra.mrb[6].mxu0 %vm146_vm6, %v694_v61 }
 0xe32   :  { %2458 = vmatpush3.bf16.msra.mxu0 %v2788_v5  ;;  %2301 = vmatprep.mubr.msk.f32.mxu0 %vm2709_vm0, %v2710_v1 }
 0xe33   :  { %2459 = vmatprep.subr.bf16.mxu0 %v2708_v0 }
 0xe36   :  { %2461 = vmatpush3.bf16.msra.mxu0 %v2803_v10 }
 0xe37   :  { %2470 = vmatprep.subr.bf16.mxu0 %v2708_v0 }
 0xf04   :  { %v765_v62 = vpop.f32.mrb[6].mxu0 }
 0xf05   :  { %v770_v63 = vrot.slane %v765_v62, 6  ;;  %v2281_v2 = vpop.f32.mrb[7].mxu0 }
 0xf07   :  { %v772_v3 = vadd.f32 %v770_v63, %v2825_v13 }
 0xf09   :  { %v2092_v4 = vmul.f32 -1.442695, %v772_v3 }
 0xf0b   :  { %2571 = vpow2.f32 %v2092_v4 }
 0xf0c   :  { %2573 = vtanh.f32 %v772_v3  ;;  %v1033_v3 = vld [vmem:[%s3135_s4 + $0x8] sm:$0xff] }
 0xf15   :  { %v2572_v6 = vpop.eup %2571 }
 0xf16   :  { %v777_v7 = vadd.f32 1.0, %v2572_v6  ;;  %v2574_v5 = vpop.eup %2573  ;;  %v1124_v6 = vld [vmem:[%s3136_s5] sm:$0xff] }
 0xf18   :  { %2575 = vrcp.f32 %v777_v7  ;;  %v1034_v7 = vld [vmem:[%s3135_s4 + $0x10] sm:$0xff] }
 0xf22   :  { %v2576_v8 = vpop.eup %2575 }
 0xf23   :  { %v780_v9 = vsel %vm2830_vm4, %v2574_v5, %v2576_v8  ;;  %v1035_v8 = vld [vmem:[%s3135_s4 + $0x18] sm:$0xff] }
 0xf24   :  { %786 = vrot.lane.b32.xlu0 %v780_v9, %s2711_s2  ;;  %v784_v14 = vmul.f32 %v782_v12, %v780_v9 }
 0xf96   :  { %v787_v10 = vpop.permute.xlu0 %786 }
 0xf97   :  { %v789_v11 = vmul.f32 %v787_v10, %v780_v9  ;;  %v1127_v10 = vld [vmem:[%s3136_s5 + $0x18] sm:$0xff] }
 0xf99   :  { %791 = vrot.lane.b32.xlu1 %v789_v11, %s2712_s3  ;;  %v2466_v11 = vpack.c.bf16 %v1035_v8, %v1034_v7 }
0x100b   :  { %v792_v16 = vpop.permute.xlu1 %791 }
0x100c   :  { %v794_v17 = vadd.f32 %v792_v16, %v784_v14 }
0x100e   :  { %2577 = vtanh.f32 %v794_v17  ;;  %v894_v36 = vrot.slane %v794_v17, 6 }
0x1018   :  { %v2578_v19 = vpop.eup %2577 }
0x1019   :  { %797 = vrot.lane.b32.xlu0 %v2578_v19, %s2711_s2 }
0x108b   :  { %v798_v20 = vpop.permute.xlu0 %797 }
0x108c   :  { %v2919_v21 = vmul.f32 %v798_v20, %v780_v9  ;;  %v1126_v9 = vld [vmem:[%s3136_s5 + $0x10] sm:$0xff] }
0x108d   :  { %v2979_v12 = vpack.c.bf16 %v1127_v10, %v1126_v9 }
0x108e   :  { %v806_v22 = vrot.slane %v2919_v21, 2 }
0x1090   :  { %807 = vrot.lane.b32.xlu1 %v806_v22, %s2712_s3 }
0x1102   :  { %v808_v23 = vpop.permute.xlu1 %807 }
0x1103   :  { %2291 = vmatmul.mubr.msk.f32.vlgmr.msra.gmra.mrb[6].mxu1 %vm146_vm6, %v808_v23 }
0x11d6   :  { %v877_v25 = vpop.f32.mrb[6].mxu1 }
0x11d7   :  { %v882_v26 = vrot.slane %v877_v25, 4  ;;  %v2292_v27 = vpop.f32.mrb[7].mxu1 }
0x11d9   :  { %v884_v28 = vadd.f32 %v882_v26, %v2825_v13  ;;  %v2097_v26 = vld [vmem:[%s3137_s6] ss:$0 sm:$0xff] }
0x11db   :  { %v2094_v29 = vmul.f32 -1.442695, %v884_v28 }
0x11dd   :  { %2579 = vpow2.f32 %v2094_v29 }
0x11de   :  { %2581 = vtanh.f32 %v884_v28 }
0x11e7   :  { %v2580_v30 = vpop.eup %2579 }
0x11e8   :  { %v889_v31 = vadd.f32 1.0, %v2580_v30  ;;  %v2582_v32 = vpop.eup %2581 }
0x11ea   :  { %2583 = vrcp.f32 %v889_v31 }
0x11f4   :  { %v2584_v33 = vpop.eup %2583 }
0x11f5   :  { %v892_v34 = vsel %vm2830_vm4, %v2582_v32, %v2584_v33 }
0x11f6   :  { %898 = vrot.lane.b32.xlu0 %v892_v34, %s2711_s2  ;;  %v896_v37 = vmul.f32 %v894_v36, %v892_v34 }
0x1268   :  { %v899_v35 = vpop.permute.xlu0 %898 }
0x1269   :  { %v901_v15 = vmul.f32 %v899_v35, %v892_v34 }
0x126b   :  { %903 = vrot.lane.b32.xlu1 %v901_v15, %s2712_s3 }
0x12dd   :  { %v904_v38 = vpop.permute.xlu1 %903 }
0x12de   :  { %v906_v40 = vadd.f32 %v904_v38, %v896_v37 }
0x12e0   :  { %2585 = vtanh.f32 %v906_v40 }
0x12ea   :  { %v2586_v41 = vpop.eup %2585 }
0x12eb   :  { %909 = vrot.lane.b32.xlu0 %v2586_v41, %s2711_s2 }
0x135d   :  { %v910_v42 = vpop.permute.xlu0 %909 }
0x135e   :  { %v912_v43 = vmul.f32 %v910_v42, %v892_v34 }
0x1360   :  { %v918_v44 = vrot.slane %v912_v43, 4 }
0x1362   :  { %919 = vrot.lane.b32.xlu1 %v918_v44, %s2712_s3 }
0x13d4   :  { %v920_v45 = vpop.permute.xlu1 %919 }
0x13d5   :  { %2302 = vmatmul.mubr.msk.f32.vlgmr.msra.gmra.mrb[8].mxu0 %vm146_vm6, %v920_v45 }
0x13d6   :  { %2323 = vmatprep.mubr.msk.f32.mxu0 %vm2709_vm0, %v2710_v1 }
0x14a8   :  { %v989_v46 = vpop.f32.mrb[8].mxu0 }
0x14a9   :  { %v994_v47 = vrot.slane %v989_v46, 2  ;;  %v2303_v48 = vpop.f32.mrb[9].mxu0 }
0x14ab   :  { %v996_v49 = vadd.f32 %v994_v47, %v2825_v13  ;;  %v1006_v13 = vrot.slane %v906_v40, 6 }
0x14ad   :  { %v2096_v50 = vmul.f32 -1.442695, %v996_v49 }
0x14af   :  { %2587 = vpow2.f32 %v2096_v50 }
0x14b0   :  { %2589 = vtanh.f32 %v996_v49 }
0x14b9   :  { %v2588_v51 = vpop.eup %2587 }
0x14ba   :  { %v1001_v52 = vadd.f32 1.0, %v2588_v51  ;;  %v2590_v53 = vpop.eup %2589 }
0x14bc   :  { %2591 = vrcp.f32 %v1001_v52 }
0x14c6   :  { %v2592_v54 = vpop.eup %2591 }
0x14c7   :  { %v1004_v56 = vsel %vm2830_vm4, %v2590_v53, %v2592_v54 }
0x14c8   :  { %1010 = vrot.lane.b32.xlu0 %v1004_v56, %s2711_s2  ;;  %v1008_v59 = vmul.f32 %v1006_v13, %v1004_v56 }
0x153a   :  { %v1011_v57 = vpop.permute.xlu0 %1010 }
0x153b   :  { %v1013_v58 = vmul.f32 %v1011_v57, %v1004_v56 }
0x153d   :  { %1015 = vrot.lane.b32.xlu1 %v1013_v58, %s2712_s3 }
0x1541   :  { %357 = vrot.lane.b32.xlu1 %v2854_v55, %s2712_s3 }
0x1545   :  { %583 = vrot.lane.b32.xlu1 %v2888_v39, %s2712_s3  ;;  %v1032_v39 = vld [vmem:[%s3135_s4] sm:$0xff] }
0x1546   :  { %v2462_v4 = vpack.c.bf16 %v1033_v3, %v1032_v39 }
0x1548   :  { %2463 = vmatprep.subr.bf16.mxu1 %v2462_v4 }
0x1549   :  { %914 = vrot.lane.b32.xlu1 %v912_v43, %s2712_s3  ;;  %2465 = vmatpush3.bf16.msra.mxu1 %v2462_v4 }
0x154a   :  { %2467 = vmatprep.subr.bf16.mxu1 %v2466_v11 }
0x154d   :  { %2469 = vmatpush3.bf16.msra.mxu1 %v2466_v11 }
0x154e   :  { %2476 = vmatprep.subr.bf16.mxu1 %v2708_v0 }
0x15af   :  { %v1016_v60 = vpop.permute.xlu1 %1015 }
0x15b0   :  { %v1018_v61 = vadd.f32 %v1016_v60, %v1008_v59 }
0x15b2   :  { %2593 = vtanh.f32 %v1018_v61 }
0x15b3   :  { %v358_v62 = vpop.permute.xlu1 %357 }
0x15b4   :  { %361 = vst.msk [vmem:[#allocation2] sm:$0xc] %vm360_vm7, %v358_v62 }
0x15b7   :  { %v584_v63 = vpop.permute.xlu1 %583 }
0x15b8   :  { %587 = vst.msk [vmem:[#allocation2] sm:$0xc0] %vm586_vm8, %v584_v63 }
0x15bb   :  { %v915_v55 = vpop.permute.xlu1 %914 }
0x15bc   :  { %v2594_v2 = vpop.eup %2593  ;;  %917 = vst.msk [vmem:[#allocation2 + $0x8] sm:$0x30] %vm473_vm9, %v915_v55 }
0x15bd   :  { %1021 = vrot.lane.b32.xlu0 %v2594_v2, %s2711_s2 }
0x15c1   :  { %470 = vrot.lane.b32.xlu0 %v2871_v18, %s2712_s3  ;;  %v1125_v18 = vld [vmem:[%s3136_s5 + $0x8] sm:$0xff] }
0x15c2   :  { %v2967_v5 = vpack.c.bf16 %v1125_v18, %v1124_v6 }
0x15c4   :  { %2472 = vmatpush3.bf16.msra.mxu0 %v2967_v5 }
0x15c5   :  { %802 = vrot.lane.b32.xlu0 %v2919_v21, %s2712_s3  ;;  %2473 = vmatprep.subr.bf16.mxu0 %v2708_v0 }
0x15c8   :  { %2475 = vmatpush3.bf16.msra.mxu0 %v2979_v12 }
0x15c9   :  { %2482 = vmatprep.subr.bf16.mxu0 %v2708_v0 }
0x15cb   :  { %2324 = vmatmul.mubr.f32.vlgmr.msra.gmra.mrb[10].mxu0 %v2710_v1 }
0x15cc   :  { %2484 = vmatpush3.bf16.msra.mxu0 %v2967_v5  ;;  %2345 = vmatprep.mubr.msk.f32.mxu0 %vm2709_vm0, %v2710_v1 }
0x15cd   :  { %2485 = vmatprep.subr.bf16.mxu0 %v2708_v0 }
0x15d0   :  { %2487 = vmatpush3.bf16.msra.mxu0 %v2979_v12 }
0x15d1   :  { %2494 = vmatprep.subr.bf16.mxu0 %v2708_v0 }
0x162f   :  { %v1022_v14 = vpop.permute.xlu0 %1021 }
0x1630   :  { %v1024_v16 = vmul.f32 %v1022_v14, %v1004_v56 }
0x1632   :  { %1026 = vrot.lane.b32.xlu0 %v1024_v16, %s2712_s3 }
0x1633   :  { %v471_v17 = vpop.permute.xlu0 %470 }
0x1634   :  { %474 = vst.msk [vmem:[#allocation2] sm:$0x30] %vm473_vm9, %v471_v17 }
0x1637   :  { %v803_v19 = vpop.permute.xlu0 %802 }
0x1638   :  { %805 = vst.msk [vmem:[#allocation2 + $0x8] sm:$0xc] %vm360_vm7, %v803_v19 }
0x163b   :  { %v1030_v20 = vld [vmem:[#allocation2] sm:$0xff] }
0x163c   :  { %2312 = vmatprep.mubr.msk.f32.mxu1 %vm146_vm6, %v1030_v20 }
0x169e   :  { %v1194_v23 = vpop.f32.mrb[10].mxu0 }
0x169f   :  { %v2325_v25 = vpop.f32.mrb[11].mxu0 }
0x16a4   :  { %v1027_v21 = vpop.permute.xlu0 %1026 }
0x16a5   :  { %1029 = vst.msk [vmem:[#allocation2 + $0x8] sm:$0xc0] %vm586_vm8, %v1027_v21 }
0x16ac   :  { %v1031_v22 = vld [vmem:[#allocation2 + $0x8] sm:$0xff] }
0x16ad   :  { %2313 = vmatmul.mubr.msk.f32.vlgmr.msra.gmra.mrb[8].mxu1 %vm146_vm6, %v1031_v22 }
0x16ae   :  { %2478 = vmatpush3.bf16.msra.mxu1 %v2967_v5  ;;  %2334 = vmatprep.mubr.msk.f32.mxu1 %vm2709_vm0, %v2710_v1 }
0x16af   :  { %2479 = vmatprep.subr.bf16.mxu1 %v2708_v0 }
0x16b2   :  { %2481 = vmatpush3.bf16.msra.mxu1 %v2979_v12 }
0x16b3   :  { %2488 = vmatprep.subr.bf16.mxu1 %v2708_v0 }
0x1780   :  { %v2314_v27 = vpop.f32.mrb[8].mxu1 }
0x1781   :  { %v3007_v28 = vadd.f32 %v2314_v27, %v2097_v26  ;;  %v1115_v29 = vpop.f32.mrb[9].mxu1 }
0x1782   :  { %v3009_v30 = vadd.f32 %v2097_v26, %v1115_v29 }
0x1784   :  { %v1198_v31 = vadd.f32 %v1194_v23, %v3009_v30 }
0x1786   :  { %v2100_v32 = vmul.f32 -1.442695, %v1198_v31 }
0x1788   :  { %2595 = vpow2.f32 %v2100_v32 }
0x1789   :  { %2597 = vtanh.f32 %v1198_v31 }
0x1792   :  { %v2596_v33 = vpop.eup %2595 }
0x1793   :  { %v1203_v34 = vadd.f32 1.0, %v2596_v33  ;;  %v2598_v35 = vpop.eup %2597 }
0x1795   :  { %2599 = vrcp.f32 %v1203_v34 }
0x179f   :  { %v2600_v15 = vpop.eup %2599 }
0x17a0   :  { %v1206_v36 = vsel %vm2830_vm4, %v2598_v35, %v2600_v15 }
0x17a1   :  { %1209 = vrot.lane.b32.xlu1 %v1206_v36, %s2711_s2  ;;  %v1207_v40 = vmul.f32 0.0, %v1206_v36 }
0x1813   :  { %v1210_v37 = vpop.permute.xlu1 %1209 }
0x1814   :  { %v1212_v38 = vmul.f32 %v1210_v37, %v1206_v36 }
0x1816   :  { %1214 = vrot.lane.b32.xlu0 %v1212_v38, %s2712_s3 }
0x1888   :  { %v1215_v41 = vpop.permute.xlu0 %1214 }
0x1889   :  { %v1217_v42 = vadd.f32 %v1215_v41, %v1207_v40 }
0x188b   :  { %2601 = vtanh.f32 %v1217_v42  ;;  %v1312_v59 = vrot.slane %v1217_v42, 6 }
0x1895   :  { %v2602_v43 = vpop.eup %2601 }
0x1896   :  { %1220 = vrot.lane.b32.xlu1 %v2602_v43, %s2711_s2 }
0x1908   :  { %v1221_v44 = vpop.permute.xlu1 %1220 }
0x1909   :  { %v1223_v45 = vmul.f32 %v1221_v44, %v1206_v36 }
0x190b   :  { %1225 = vrot.lane.b32.xlu0 %v1223_v45, %s2712_s3 }
0x197d   :  { %v1226_v46 = vpop.permute.xlu0 %1225 }
0x197e   :  { %2335 = vmatmul.mubr.msk.f32.vlgmr.msra.gmra.mrb[10].mxu1 %vm146_vm6, %v1226_v46 }
0x197f   :  { %2490 = vmatpush3.bf16.msra.mxu1 %v2967_v5  ;;  %2356 = vmatprep.mubr.msk.f32.mxu1 %vm2709_vm0, %v2710_v1 }
0x1980   :  { %2491 = vmatprep.subr.bf16.mxu1 %v2708_v0 }
0x1983   :  { %2493 = vmatpush3.bf16.msra.mxu1 %v2979_v12 }
0x1984   :  { %2500 = vmatprep.subr.bf16.mxu1 %v2708_v0 }
0x1a51   :  { %v1295_v47 = vpop.f32.mrb[10].mxu1 }
0x1a52   :  { %v1300_v48 = vrot.slane %v1295_v47, 6  ;;  %v2336_v49 = vpop.f32.mrb[11].mxu1 }
0x1a54   :  { %v1302_v50 = vadd.f32 %v1300_v48, %v3009_v30 }
0x1a56   :  { %v2102_v51 = vmul.f32 -1.442695, %v1302_v50 }
0x1a58   :  { %2603 = vpow2.f32 %v2102_v51 }
0x1a59   :  { %2605 = vtanh.f32 %v1302_v50 }
0x1a62   :  { %v2604_v52 = vpop.eup %2603 }
0x1a63   :  { %v1307_v53 = vadd.f32 1.0, %v2604_v52  ;;  %v2606_v54 = vpop.eup %2605 }
0x1a65   :  { %2607 = vrcp.f32 %v1307_v53 }
0x1a6f   :  { %v2608_v56 = vpop.eup %2607 }
0x1a70   :  { %v1310_v57 = vsel %vm2830_vm4, %v2606_v54, %v2608_v56 }
0x1a71   :  { %1316 = vrot.lane.b32.xlu1 %v1310_v57, %s2711_s2  ;;  %v1314_v60 = vmul.f32 %v1312_v59, %v1310_v57 }
0x1ae3   :  { %v1317_v58 = vpop.permute.xlu1 %1316 }
0x1ae4   :  { %v1319_v13 = vmul.f32 %v1317_v58, %v1310_v57 }
0x1ae6   :  { %1321 = vrot.lane.b32.xlu0 %v1319_v13, %s2712_s3 }
0x1b58   :  { %v1322_v61 = vpop.permute.xlu0 %1321 }
0x1b59   :  { %v1324_v62 = vadd.f32 %v1322_v61, %v1314_v60 }
0x1b5b   :  { %2609 = vtanh.f32 %v1324_v62  ;;  %v1420_v20 = vrot.slane %v1324_v62, 6 }
0x1b65   :  { %v2610_v63 = vpop.eup %2609 }
0x1b66   :  { %1327 = vrot.lane.b32.xlu1 %v2610_v63, %s2711_s2 }
0x1bd8   :  { %v1328_v55 = vpop.permute.xlu1 %1327 }
0x1bd9   :  { %v1330_v2 = vmul.f32 %v1328_v55, %v1310_v57 }
0x1bdb   :  { %v1332_v39 = vrot.slane %v1330_v2, 2 }
0x1bdd   :  { %1333 = vrot.lane.b32.xlu0 %v1332_v39, %s2712_s3 }
0x1c4f   :  { %v1334_v3 = vpop.permute.xlu0 %1333 }
0x1c50   :  { %2346 = vmatmul.mubr.msk.f32.vlgmr.msra.gmra.mrb[12].mxu0 %vm146_vm6, %v1334_v3 }
0x1c51   :  { %2496 = vmatpush3.bf16.msra.mxu0 %v2967_v5  ;;  %2367 = vmatprep.mubr.msk.f32.mxu0 %vm2709_vm0, %v2710_v1 }
0x1c52   :  { %2497 = vmatprep.subr.bf16.mxu0 %v2708_v0 }
0x1c55   :  { %2499 = vmatpush3.bf16.msra.mxu0 %v2979_v12 }
0x1c56   :  { %2506 = vmatprep.subr.bf16.mxu0 %v2708_v0 }
0x1d23   :  { %v1403_v4 = vpop.f32.mrb[12].mxu0 }
0x1d24   :  { %v1408_v6 = vrot.slane %v1403_v4, 4  ;;  %v2347_v18 = vpop.f32.mrb[13].mxu0 }
0x1d26   :  { %v1410_v7 = vadd.f32 %v1408_v6, %v3009_v30 }
0x1d28   :  { %v2104_v8 = vmul.f32 -1.442695, %v1410_v7 }
0x1d2a   :  { %2611 = vpow2.f32 %v2104_v8 }
0x1d2b   :  { %2613 = vtanh.f32 %v1410_v7 }
0x1d34   :  { %v2612_v9 = vpop.eup %2611 }
0x1d35   :  { %v1415_v10 = vadd.f32 1.0, %v2612_v9  ;;  %v2614_v11 = vpop.eup %2613 }
0x1d37   :  { %2615 = vrcp.f32 %v1415_v10 }
0x1d41   :  { %v2616_v14 = vpop.eup %2615 }
0x1d42   :  { %v1418_v16 = vsel %vm2830_vm4, %v2614_v11, %v2616_v14 }
0x1d43   :  { %1424 = vrot.lane.b32.xlu1 %v1418_v16, %s2711_s2  ;;  %v1422_v21 = vmul.f32 %v1420_v20, %v1418_v16 }
0x1db5   :  { %v1425_v17 = vpop.permute.xlu1 %1424 }
0x1db6   :  { %v1427_v19 = vmul.f32 %v1425_v17, %v1418_v16 }
0x1db8   :  { %1429 = vrot.lane.b32.xlu0 %v1427_v19, %s2712_s3 }
0x1e2a   :  { %v1430_v22 = vpop.permute.xlu0 %1429 }
0x1e2b   :  { %v1432_v23 = vadd.f32 %v1430_v22, %v1422_v21 }
0x1e2d   :  { %2617 = vtanh.f32 %v1432_v23  ;;  %v1528_v44 = vrot.slane %v1432_v23, 6 }
0x1e37   :  { %v2618_v25 = vpop.eup %2617 }
0x1e38   :  { %1435 = vrot.lane.b32.xlu1 %v2618_v25, %s2711_s2 }
0x1eaa   :  { %v1436_v26 = vpop.permute.xlu1 %1435 }
0x1eab   :  { %v1438_v27 = vmul.f32 %v1436_v26, %v1418_v16 }
0x1ead   :  { %v1440_v29 = vrot.slane %v1438_v27, 4 }
0x1eaf   :  { %1441 = vrot.lane.b32.xlu0 %v1440_v29, %s2712_s3 }
0x1f21   :  { %v1442_v31 = vpop.permute.xlu0 %1441 }
0x1f22   :  { %2357 = vmatmul.mubr.msk.f32.vlgmr.msra.gmra.mrb[12].mxu1 %vm146_vm6, %v1442_v31 }
0x1f23   :  { %2502 = vmatpush3.bf16.msra.mxu1 %v2967_v5  ;;  %2378 = vmatprep.mubr.msk.f32.mxu1 %vm2709_vm0, %v2710_v1 }
0x1f24   :  { %2503 = vmatprep.subr.bf16.mxu1 %v2708_v0 }
0x1f27   :  { %2505 = vmatpush3.bf16.msra.mxu1 %v2979_v12 }
0x1f28   :  { %2512 = vmatprep.subr.bf16.mxu1 %v2708_v0 }
0x1ff5   :  { %v1511_v32 = vpop.f32.mrb[12].mxu1 }
0x1ff6   :  { %v1516_v33 = vrot.slane %v1511_v32, 2  ;;  %v2358_v34 = vpop.f32.mrb[13].mxu1 }
0x1ff8   :  { %v1518_v35 = vadd.f32 %v1516_v33, %v3009_v30 }
0x1ffa   :  { %v2106_v15 = vmul.f32 -1.442695, %v1518_v35 }
0x1ffc   :  { %2619 = vpow2.f32 %v2106_v15 }
0x1ffd   :  { %2621 = vtanh.f32 %v1518_v35 }
0x2006   :  { %v2620_v36 = vpop.eup %2619 }
0x2007   :  { %v1523_v37 = vadd.f32 1.0, %v2620_v36  ;;  %v2622_v38 = vpop.eup %2621 }
0x2009   :  { %2623 = vrcp.f32 %v1523_v37 }
0x2013   :  { %v2624_v40 = vpop.eup %2623 }
0x2014   :  { %v1526_v41 = vsel %vm2830_vm4, %v2622_v38, %v2624_v40 }
0x2015   :  { %1532 = vrot.lane.b32.xlu1 %v1526_v41, %s2711_s2  ;;  %v1530_v45 = vmul.f32 %v1528_v44, %v1526_v41 }
0x2087   :  { %v1533_v42 = vpop.permute.xlu1 %1532 }
0x2088   :  { %v1535_v43 = vmul.f32 %v1533_v42, %v1526_v41 }
0x208a   :  { %1537 = vrot.lane.b32.xlu0 %v1535_v43, %s2712_s3 }
0x20fc   :  { %v1538_v30 = vpop.permute.xlu0 %1537 }
0x20fd   :  { %v1540_v46 = vadd.f32 %v1538_v30, %v1530_v45 }
0x20ff   :  { %2625 = vtanh.f32 %v1540_v46  ;;  %v1633_v63 = vrot.slane %v1540_v46, 6 }
0x2109   :  { %v2626_v47 = vpop.eup %2625 }
0x210a   :  { %1543 = vrot.lane.b32.xlu1 %v2626_v47, %s2711_s2 }
0x217c   :  { %v1544_v48 = vpop.permute.xlu1 %1543 }
0x217d   :  { %v1546_v49 = vmul.f32 %v1544_v48, %v1526_v41 }
0x217f   :  { %v1548_v50 = vrot.slane %v1546_v49, 6 }
0x2181   :  { %1549 = vrot.lane.b32.xlu0 %v1548_v50, %s2712_s3 }
0x21f3   :  { %v1550_v51 = vpop.permute.xlu0 %1549 }
0x21f4   :  { %2368 = vmatmul.mubr.msk.f32.vlgmr.msra.gmra.mrb[14].mxu0 %vm146_vm6, %v1550_v51 }
0x21f5   :  { %2508 = vmatpush3.bf16.msra.mxu0 %v2967_v5  ;;  %2389 = vmatprep.mubr.msk.f32.mxu0 %vm2709_vm0, %v2710_v1 }
0x21f6   :  { %2509 = vmatprep.subr.bf16.mxu0 %v2708_v0 }
0x21f9   :  { %2511 = vmatpush3.bf16.msra.mxu0 %v2979_v12 }
0x21fa   :  { %2518 = vmatprep.subr.bf16.mxu0 %v2708_v0 }
0x22c7   :  { %v1619_v52 = vpop.f32.mrb[14].mxu0 }
0x22c8   :  { %v1623_v53 = vadd.f32 %v1619_v52, %v3007_v28  ;;  %v2369_v54 = vpop.f32.mrb[15].mxu0 }
0x22ca   :  { %v2108_v56 = vmul.f32 -1.442695, %v1623_v53 }
0x22cc   :  { %2627 = vpow2.f32 %v2108_v56 }
0x22cd   :  { %2629 = vtanh.f32 %v1623_v53 }
0x22d6   :  { %v2628_v57 = vpop.eup %2627 }
0x22d7   :  { %v1628_v58 = vadd.f32 1.0, %v2628_v57  ;;  %v2630_v13 = vpop.eup %2629 }
0x22d9   :  { %2631 = vrcp.f32 %v1628_v58 }
0x22e3   :  { %v2632_v59 = vpop.eup %2631 }
0x22e4   :  { %v1631_v60 = vsel %vm2830_vm4, %v2630_v13, %v2632_v59 }
0x22e5   :  { %1637 = vrot.lane.b32.xlu1 %v1631_v60, %s2711_s2  ;;  %v1635_v55 = vmul.f32 %v1633_v63, %v1631_v60 }
0x2357   :  { %v1638_v61 = vpop.permute.xlu1 %1637 }
0x2358   :  { %v1640_v62 = vmul.f32 %v1638_v61, %v1631_v60 }
0x235a   :  { %1642 = vrot.lane.b32.xlu0 %v1640_v62, %s2712_s3 }
0x23cc   :  { %v1643_v2 = vpop.permute.xlu0 %1642 }
0x23cd   :  { %v1645_v39 = vadd.f32 %v1643_v2, %v1635_v55 }
0x23cf   :  { %2633 = vtanh.f32 %v1645_v39  ;;  %v1740_v21 = vrot.slane %v1645_v39, 6 }
0x23d9   :  { %v2634_v3 = vpop.eup %2633 }
0x23da   :  { %1648 = vrot.lane.b32.xlu1 %v2634_v3, %s2711_s2  ;;  %v1975_v3 = vld [vmem:[%s3138_s7] sm:$0xff] }
0x244c   :  { %v1649_v4 = vpop.permute.xlu1 %1648 }
0x244d   :  { %v1651_v6 = vmul.f32 %v1649_v4, %v1631_v60  ;;  %v1977_v4 = vld [vmem:[%s3138_s7 + $0x10] sm:$0xff] }
0x244f   :  { %1653 = vrot.lane.b32.xlu0 %v1651_v6, %s2712_s3  ;;  %v2519_v6 = vpack.c.bf16 %v1976_v24, %v1975_v3 }
0x24c1   :  { %v1654_v18 = vpop.permute.xlu0 %1653 }
0x24c2   :  { %2379 = vmatmul.mubr.msk.f32.vlgmr.msra.gmra.mrb[14].mxu1 %vm146_vm6, %v1654_v18  ;;  %v1978_v18 = vld [vmem:[%s3138_s7 + $0x18] sm:$0xff]  ;;  %s2681_s7 = scalar_lea.vmem %s2071_s14, 32 }
0x24c3   :  { %2514 = vmatpush3.bf16.msra.mxu1 %v2967_v5  ;;  %2400 = vmatprep.mubr.msk.f32.mxu1 %vm2709_vm0, %v2710_v1  ;;  %p2682_p8 = scmp.ne.s32.totalorder %s2071_s14, %s2681_s7  ;;  %p2687_p10 = scmp.lt.s32.totalorder %s2681_s7, %s2681_s7 }
0x24c4   :  { %2515 = vmatprep.subr.bf16.mxu1 %v2708_v0 }
0x24c5   :  { %p2688_p11 = por %p2687_p10, %p2686_p9 }
0x24c7   :  { %2517 = vmatpush3.bf16.msra.mxu1 %v2979_v12  ;;  %p2689_p12 = pnand %p2688_p11, %p2682_p8 }
0x2595   :  { %v1723_v7 = vpop.f32.mrb[14].mxu1 }
0x2596   :  { %v1728_v8 = vrot.slane %v1723_v7, 6  ;;  %v2380_v9 = vpop.f32.mrb[15].mxu1  ;;  %v2522_v7 = vpack.c.bf16 %v1978_v18, %v1977_v4 }
0x2598   :  { %v1730_v10 = vadd.f32 %v1728_v8, %v3007_v28 }
0x259a   :  { %v2110_v11 = vmul.f32 -1.442695, %v1730_v10 }
0x259c   :  { %2635 = vpow2.f32 %v2110_v11 }
0x259d   :  { %2637 = vtanh.f32 %v1730_v10 }
0x25a6   :  { %v2636_v14 = vpop.eup %2635 }
0x25a7   :  { %v1735_v16 = vadd.f32 1.0, %v2636_v14  ;;  %v2638_v17 = vpop.eup %2637 }
0x25a9   :  { %2639 = vrcp.f32 %v1735_v16  ;;  %v2115_v16 = vld [vmem:[#allocation3] ss:$0 sm:$0xff] }
0x25b3   :  { %v2640_v5 = vpop.eup %2639 }
0x25b4   :  { %v1738_v19 = vsel %vm2830_vm4, %v2638_v17, %v2640_v5 }
0x25b5   :  { %1744 = vrot.lane.b32.xlu1 %v1738_v19, %s2711_s2  ;;  %v1742_v22 = vmul.f32 %v1740_v21, %v1738_v19 }
0x2627   :  { %v1745_v20 = vpop.permute.xlu1 %1744 }
0x2628   :  { %v1747_v12 = vmul.f32 %v1745_v20, %v1738_v19 }
0x262a   :  { %1749 = vrot.lane.b32.xlu0 %v1747_v12, %s2712_s3 }
0x269c   :  { %v1750_v23 = vpop.permute.xlu0 %1749 }
0x269d   :  { %v1752_v25 = vadd.f32 %v1750_v23, %v1742_v22 }
0x269f   :  { %2641 = vtanh.f32 %v1752_v25  ;;  %v1848_v44 = vrot.slane %v1752_v25, 6 }
0x26a9   :  { %v2642_v26 = vpop.eup %2641 }
0x26aa   :  { %1755 = vrot.lane.b32.xlu1 %v2642_v26, %s2711_s2 }
0x271c   :  { %v1756_v27 = vpop.permute.xlu1 %1755 }
0x271d   :  { %v1758_v29 = vmul.f32 %v1756_v27, %v1738_v19 }
0x271f   :  { %v1760_v31 = vrot.slane %v1758_v29, 2 }
0x2721   :  { %1761 = vrot.lane.b32.xlu0 %v1760_v31, %s2712_s3 }
0x2793   :  { %v1762_v32 = vpop.permute.xlu0 %1761 }
0x2794   :  { %2390 = vmatmul.mubr.msk.f32.vlgmr.msra.gmra.mrb[16].mxu0 %vm146_vm6, %v1762_v32 }
0x2795   :  { %2411 = vmatprep.mubr.msk.f32.mxu0 %vm2709_vm0, %v2710_v1  ;;  %2520 = vmatpush3.bf16.msra.mxu0 %v2519_v6 }
0x2796   :  { %2521 = vmatprep.subr.bf16.mxu0 %v2708_v0 }
0x2799   :  { %2523 = vmatpush3.bf16.msra.mxu0 %v2522_v7 }
0x2867   :  { %v1831_v33 = vpop.f32.mrb[16].mxu0 }
0x2868   :  { %v1836_v34 = vrot.slane %v1831_v33, 4  ;;  %v2391_v35 = vpop.f32.mrb[17].mxu0 }
0x286a   :  { %v1838_v15 = vadd.f32 %v1836_v34, %v3007_v28 }
0x286c   :  { %v2112_v36 = vmul.f32 -1.442695, %v1838_v15 }
0x286e   :  { %2643 = vpow2.f32 %v2112_v36 }
0x286f   :  { %2645 = vtanh.f32 %v1838_v15 }
0x2878   :  { %v2644_v37 = vpop.eup %2643 }
0x2879   :  { %v1843_v38 = vadd.f32 1.0, %v2644_v37  ;;  %v2646_v40 = vpop.eup %2645 }
0x287b   :  { %2647 = vrcp.f32 %v1843_v38 }
0x2885   :  { %v2648_v41 = vpop.eup %2647 }
0x2886   :  { %v1846_v42 = vsel %vm2830_vm4, %v2646_v40, %v2648_v41 }
0x2887   :  { %1852 = vrot.lane.b32.xlu1 %v1846_v42, %s2711_s2  ;;  %v1850_v45 = vmul.f32 %v1848_v44, %v1846_v42 }
0x28f9   :  { %v1853_v43 = vpop.permute.xlu1 %1852 }
0x28fa   :  { %v1855_v1 = vmul.f32 %v1853_v43, %v1846_v42 }
0x28fc   :  { %1857 = vrot.lane.b32.xlu0 %v1855_v1, %s2712_s3 }
0x296e   :  { %v1858_v30 = vpop.permute.xlu0 %1857 }
0x296f   :  { %v1860_v46 = vadd.f32 %v1858_v30, %v1850_v45 }
0x2971   :  { %2649 = vtanh.f32 %v1860_v46  ;;  %v1956_v55 = vrot.slane %v1860_v46, 6 }
0x297b   :  { %v2650_v47 = vpop.eup %2649 }
0x297c   :  { %1863 = vrot.lane.b32.xlu1 %v2650_v47, %s2711_s2 }
0x29ee   :  { %v1864_v48 = vpop.permute.xlu1 %1863 }
0x29ef   :  { %v1866_v49 = vmul.f32 %v1864_v48, %v1846_v42 }
0x29f1   :  { %v1868_v50 = vrot.slane %v1866_v49, 4 }
0x29f3   :  { %1869 = vrot.lane.b32.xlu0 %v1868_v50, %s2712_s3 }
0x2a65   :  { %v1870_v51 = vpop.permute.xlu0 %1869 }
0x2a66   :  { %2401 = vmatmul.mubr.msk.f32.vlgmr.msra.gmra.mrb[16].mxu1 %vm146_vm6, %v1870_v51 }
0x2b39   :  { %v1939_v52 = vpop.f32.mrb[16].mxu1 }
0x2b3a   :  { %v1944_v53 = vrot.slane %v1939_v52, 2  ;;  %v2402_v54 = vpop.f32.mrb[17].mxu1 }
0x2b3c   :  { %v1946_v56 = vadd.f32 %v1944_v53, %v3007_v28 }
0x2b3e   :  { %v2114_v57 = vmul.f32 -1.442695, %v1946_v56 }
0x2b40   :  { %2651 = vpow2.f32 %v2114_v57 }
0x2b41   :  { %2653 = vtanh.f32 %v1946_v56 }
0x2b4a   :  { %v2652_v58 = vpop.eup %2651 }
0x2b4b   :  { %v1951_v13 = vadd.f32 1.0, %v2652_v58  ;;  %v2654_v59 = vpop.eup %2653 }
0x2b4d   :  { %2655 = vrcp.f32 %v1951_v13 }
0x2b57   :  { %v2656_v60 = vpop.eup %2655 }
0x2b58   :  { %v1954_v61 = vsel %vm2830_vm4, %v2654_v59, %v2656_v60 }
0x2b59   :  { %1960 = vrot.lane.b32.xlu1 %v1954_v61, %s2711_s2  ;;  %v1958_v2 = vmul.f32 %v1956_v55, %v1954_v61 }
0x2bcb   :  { %v1961_v62 = vpop.permute.xlu1 %1960 }
0x2bcc   :  { %v1963_v63 = vmul.f32 %v1961_v62, %v1954_v61 }
0x2bce   :  { %1965 = vrot.lane.b32.xlu0 %v1963_v63, %s2712_s3 }
0x2c40   :  { %v1966_v28 = vpop.permute.xlu0 %1965 }
0x2c41   :  { %v1968_v39 = vadd.f32 %v1966_v28, %v1958_v2 }
0x2c43   :  { %2657 = vtanh.f32 %v1968_v39 }
0x2c4d   :  { %v2658_v8 = vpop.eup %2657 }
0x2c4e   :  { %1971 = vrot.lane.b32.xlu1 %v2658_v8, %s2711_s2 }
0x2cc0   :  { %v1972_v9 = vpop.permute.xlu1 %1971 }
0x2cc1   :  { %v1974_v10 = vmul.f32 %v1972_v9, %v1954_v61 }
0x2cc3   :  { %v1987_v11 = vrot.slane %v1974_v10, 6 }
0x2cc5   :  { %1988 = vrot.lane.b32.xlu0 %v1987_v11, %s2712_s3 }
0x2d37   :  { %v1989_v14 = vpop.permute.xlu0 %1988 }
0x2d38   :  { %2412 = vmatmul.mubr.msk.f32.vlgmr.msra.gmra.mrb[18].mxu0 %vm146_vm6, %v1989_v14 }
0x2e0b   :  { %v2058_v17 = vpop.f32.mrb[18].mxu0 }
0x2e0c   :  { %v2059_v5 = vadd.f32 %v2115_v16, %v2058_v17  ;;  %v2413_v19 = vpop.f32.mrb[19].mxu0 }
0x2e0e   :  { %2063 = vst.msk [vmem:[#allocation6] sm:$0x3] %vm2062_vm10, %v2059_v5 }
0x2e0f   :  { %2692 = shalt.err (!%p2689_p12)
}
0x2e10   :  { %s2693_s15 = scalar_lea.hbm %s3140_s9, 32 }
0x2e11   :  { %p2694_p13 = scmp.ne.s32.totalorder %s3140_s9, %s2693_s15  ;;  %p2697_p0 = scmp.lt.u32.totalorder %s2693_s15, %s3140_s9 }
0x2e13   :  { %p2699_p1 = pnand %p2697_p0, %p2694_p13 }
0x2e15   :  { %2702 = shalt.err (!%p2699_p1)
}
0x2e16   :  { %2073 = dma.vmem_to_hbm [thread:$0]  %s2071_s14, 32, %s3140_s9, [#allocation5]  }
0x2e17   :  { %2705 = dma.done.wait [#allocation5], 32  }
0x2e18   :  { %2706 = vsyncadd [#allocation5], 4294967264 }
0x2e19   :  { %2077 = vsyncpa [#allocation4], 1 }
0x2e1a   :  { %2078 = vsyncpa [#allocation5], 1 }

</bundles_post_ra>
